<compile_context>
chip_gen: v7x
topology: tpu7x:2x2x1
jax: 0.10.0
libtpu: 0.0.40
codegen_flags: <defaults>
</compile_context>

<pallas_src>
import functools
import math

import jax
import jax.numpy as jnp
from jax.experimental import pallas as pl
from jax.experimental.pallas import tpu as pltpu

# ----------------------------- config (small, synthetic BERT) ----------------
HIDDEN = 32
NUM_HEADS = 2
HEAD_DIM = HIDDEN // NUM_HEADS
INTERMEDIATE = 64
NUM_LAYERS = 2
VOCAB = 100
VOCAB_PAD = 128           # word table padded to 128 rows for the one-hot gather
MAX_POS = 64
TYPE_VOCAB = 2
LN_EPS = 1e-12
LOGIT_PAD = 128           # lane-dense padded width for all logit outputs
QKV_PAD = 128             # lane-dense padded width for the fused QKV projection

BATCH = 2
SEQ = 8

TASKS_NUM_CLASSES = [3, 5]
TASK_TYPES = ["classification", "sequence_labeling"]
MULTILABEL = [False, False]
ONE_HOT_LABELS = [False, False]
WEIGHTS = [None, None]


def _vmem_spec():
    return pl.BlockSpec(memory_space=pltpu.MemorySpace.VMEM)


# ----------------------------- in-kernel helpers ------------------------------
def _layer_norm(x, gamma, beta):
    mu = jnp.mean(x, axis=-1, keepdims=True)
    var = jnp.mean((x - mu) ** 2, axis=-1, keepdims=True)
    return (x - mu) * jax.lax.rsqrt(var + LN_EPS) * gamma + beta


def _gelu(x):
    # tanh-approximate GELU: the synthetic backbone is defined with gelu_new.
    return 0.5 * x * (1.0 + jnp.tanh(0.7978845608028654 * (x + 0.044715 * x * x * x)))


def _mm(a, b):
    # MXU matmul: bf16 operands, f32 accumulation.  Weights are pre-cast bf16
    # in the wrapper; each activation is cast exactly once (single use).
    return jnp.dot(a.astype(jnp.bfloat16), b.astype(jnp.bfloat16),
                   preferred_element_type=jnp.float32)


def _qk(qh, kh):
    # (BH, S, D) x (BH, S, D) -> (BH, S, S), batched over merged (batch*head).
    return jnp.einsum("bqd,bkd->bqk",
                      qh.astype(jnp.bfloat16), kh.astype(jnp.bfloat16),
                      preferred_element_type=jnp.float32)


def _pv(p, vh):
    # (BH, S, S) x (BH, S, D) -> (BH, S, D), batched over merged (batch*head).
    return jnp.einsum("bqk,bkd->bqd",
                      p.astype(jnp.bfloat16), vh.astype(jnp.bfloat16),
                      preferred_element_type=jnp.float32)


def _masked_ce_mean(logits_pad, labels_col, num_valid):
    """CrossEntropyLoss (mean, int targets) over the first num_valid lanes.

    logits_pad: (N, LOGIT_PAD) f32 (padded lanes are zero),
    labels_col: (N, 1) int32.  Returns (1, 1) f32.
    """
    n = logits_pad.shape[0]
    lane = jax.lax.broadcasted_iota(jnp.int32, logits_pad.shape, 1)
    masked = jnp.where(lane < num_valid, logits_pad, jnp.float32(-1e30))
    m = jnp.max(masked, axis=-1, keepdims=True)
    lse = m + jnp.log(jnp.sum(jnp.exp(masked - m), axis=-1, keepdims=True))
    logp = logits_pad - lse
    onehot = lane == labels_col
    nll = -jnp.sum(jnp.where(onehot, logp, 0.0), axis=-1, keepdims=True)  # (N, 1)
    return jnp.sum(nll, axis=0, keepdims=True) / float(n)                 # (1, 1)


# ----------------------------- the fused kernel --------------------------------
def _fused_forward_kernel(
    ids_ref, ttype_ref, mask_ref, cls_lab_ref, seq_lab_ref,
    word_ref, pos_ref, type_ref, embg_ref, embb_ref,
    wqkv_ref, bqkv_ref, wo_ref, bo_ref, ln1g_ref, ln1b_ref,
    w1_ref, b1_ref, w2_ref, b2_ref, ln2g_ref, ln2b_ref,
    wp_ref, bp_ref, wc0_ref, bc0_ref, wc1_ref, bc1_ref,
    cls_logits_ref, seq_logits_ref, scalars_ref,
    *, compute_cls_loss, compute_seq_loss,
):
    B, S = mask_ref.shape
    N = B * S
    H = HIDDEN
    BH = NUM_HEADS * B
    inv_sqrt_d = 1.0 / math.sqrt(HEAD_DIM)

    # ---- fused embeddings: one-hot MXU gather (exact, f32), static pos slice,
    #      2-way select for token-type; then embedding LayerNorm --------------
    ids = ids_ref[...]                                              # (N, 1) int32
    lane_v = jax.lax.broadcasted_iota(jnp.int32, (N, VOCAB_PAD), 1)
    onehot = (lane_v == ids).astype(jnp.float32)                    # (N, VOCAB_PAD)
    word = jnp.dot(onehot, word_ref[...],
                   preferred_element_type=jnp.float32)              # (N, H) exact gather
    pos = jnp.broadcast_to(pos_ref[0:S, :][None, :, :], (B, S, H)).reshape(N, H)
    tids = ttype_ref[...]                                           # (N, 1) int32
    typ = jnp.where(tids == 0, type_ref[0:1, :], type_ref[1:2, :])  # TYPE_VOCAB == 2
    h = _layer_norm(word + pos + typ, embg_ref[...], embb_ref[...])

    # additive attention bias, head-major merged batch, hoisted out of the loop
    bias_row = (mask_ref[...] - 1.0) * 10000.0                      # (B, S)
    bias_bh = jnp.broadcast_to(bias_row[None, :, :], (NUM_HEADS, B, S)).reshape(BH, S)
    bias_bh = jnp.broadcast_to(bias_bh[:, None, :], (BH, S, S))

    def split_heads(x):
        # (N, NUM_HEADS*HEAD_DIM) -> (NUM_HEADS*B, S, HEAD_DIM), head-major batch
        return jnp.concatenate(
            [x[:, hd * HEAD_DIM:(hd + 1) * HEAD_DIM].reshape(B, S, HEAD_DIM)
             for hd in range(NUM_HEADS)], axis=0)

    # ---- transformer encoder (NUM_LAYERS=2: short static unroll) ----
    for l in range(NUM_LAYERS):
        # single fused lane-dense QKV projection: (N,H) x (H,128) -> (N,128)
        qkv = _mm(h, wqkv_ref[l]) + bqkv_ref[l]
        qm = split_heads(qkv[:, 0:H])            # (BH, S, HEAD_DIM)
        km = split_heads(qkv[:, H:2 * H])
        vm = split_heads(qkv[:, 2 * H:3 * H])

        sc = _qk(qm, km) * inv_sqrt_d + bias_bh  # (BH, S, S)
        m = jnp.max(sc, axis=-1, keepdims=True)
        p = jnp.exp(sc - m)
        p = p * pl.reciprocal(jnp.sum(p, axis=-1, keepdims=True), approx=True)
        ctxm = _pv(p, vm)                        # (BH, S, HEAD_DIM)
        ctx = jnp.concatenate(
            [ctxm[hd * B:(hd + 1) * B].reshape(N, HEAD_DIM) for hd in range(NUM_HEADS)],
            axis=-1)                             # (N, H)

        attn = _mm(ctx, wo_ref[l]) + bo_ref[l]
        h1 = _layer_norm(h + attn, ln1g_ref[l], ln1b_ref[l])
        ff = _mm(_gelu(_mm(h1, w1_ref[l]) + b1_ref[l]), w2_ref[l]) + b2_ref[l]
        h = _layer_norm(h1 + ff, ln2g_ref[l], ln2b_ref[l])

    # ---- task 0: classification head (CLS -> pooler -> tanh -> classifier) ----
    cls_tok = h.reshape(B, S, H)[:, 0, :]                           # (B, H) strided select
    pooled = jnp.tanh(_mm(cls_tok, wp_ref[...]) + bp_ref[...])
    cls_logits = _mm(pooled, wc0_ref[...]) + bc0_ref[...]           # (B, LOGIT_PAD)
    cls_logits_ref[...] = cls_logits
    if compute_cls_loss:
        cls_loss = _masked_ce_mean(cls_logits, cls_lab_ref[...], TASKS_NUM_CLASSES[0])
    else:
        cls_loss = jnp.zeros((1, 1), jnp.float32)

    # ---- task 1: sequence labeling head (per-token classifier) ----
    # Note: like the reference module, the CE averages over ALL tokens
    # (no attention-mask / ignore_index filtering).
    seq_logits = _mm(h, wc1_ref[...]) + bc1_ref[...]                # (N, LOGIT_PAD)
    seq_logits_ref[...] = seq_logits
    if compute_seq_loss:
        seq_loss = _masked_ce_mean(seq_logits, seq_lab_ref[...], TASKS_NUM_CLASSES[1])
    else:
        seq_loss = jnp.zeros((1, 1), jnp.float32)

    # ---- packed scalar outputs: lane 0 = cls loss, lane 1 = seq loss ----
    lane = jax.lax.broadcasted_iota(jnp.int32, (1, LOGIT_PAD), 1)
    scalars_ref[...] = (jnp.where(lane == 0, cls_loss, 0.0)
                        + jnp.where(lane == 1, seq_loss, 0.0))


def fused_forward(ids2, ttype2, mask, cls_lab2, seq_lab2, tables, stacked, head,
                  compute_cls_loss, compute_seq_loss):
    """Single fused pallas_call for the whole multi-task forward pass."""
    B, S = mask.shape
    N = B * S
    kernel = functools.partial(_fused_forward_kernel,
                               compute_cls_loss=compute_cls_loss,
                               compute_seq_loss=compute_seq_loss)
    args = (
        ids2, ttype2, mask, cls_lab2, seq_lab2,
        tables["word"], tables["pos"], tables["type"],
        head["emb_ln_g"], head["emb_ln_b"],
        stacked["wqkv"], stacked["bqkv"], stacked["wo"], stacked["bo"],
        stacked["ln1_g"], stacked["ln1_b"], stacked["w1"], stacked["b1"],
        stacked["w2"], stacked["b2"], stacked["ln2_g"], stacked["ln2_b"],
        head["pooler_w"], head["pooler_b"],
        head["cls_w"][0], head["cls_b"][0], head["cls_w"][1], head["cls_b"][1],
    )
    return pl.pallas_call(
        kernel,
        out_shape=(
            jax.ShapeDtypeStruct((B, LOGIT_PAD), jnp.float32),   # cls logits (padded)
            jax.ShapeDtypeStruct((N, LOGIT_PAD), jnp.float32),   # seq logits (padded)
            jax.ShapeDtypeStruct((1, LOGIT_PAD), jnp.float32),   # packed losses
        ),
        in_specs=[_vmem_spec() for _ in args],
        out_specs=(_vmem_spec(), _vmem_spec(), _vmem_spec()),
    )(*args)


@functools.partial(jax.jit, static_argnames=("compute_cls_loss", "compute_seq_loss"))
def _run_model(input_ids, attention_mask, token_type_ids, cls_labels, seq_labels,
               tables, stacked, head, *, compute_cls_loss, compute_seq_loss):
    return fused_forward(
        input_ids.reshape(-1, 1).astype(jnp.int32),
        token_type_ids.reshape(-1, 1).astype(jnp.int32),
        attention_mask.astype(jnp.float32),
        cls_labels, seq_labels, tables, stacked, head,
        compute_cls_loss, compute_seq_loss)


# ----------------------------- parameters -------------------------------------
def init_params():
    keys = iter(jax.random.split(jax.random.PRNGKey(0), 64))

    def nrm(shape):
        return (0.02 * jax.random.normal(next(keys), shape)).astype(jnp.float32)

    def zeros(shape):
        return jnp.zeros(shape, jnp.float32)

    params = {
        "word_emb": nrm((VOCAB, HIDDEN)),
        "pos_emb": nrm((MAX_POS, HIDDEN)),
        "type_emb": nrm((TYPE_VOCAB, HIDDEN)),
        "emb_ln_g": jnp.ones((1, HIDDEN), jnp.float32),
        "emb_ln_b": zeros((1, HIDDEN)),
        "layers": [],
        # self.bert.pooler = nn.Linear(H, H)  (new_model=False path)
        "pooler_w": nrm((HIDDEN, HIDDEN)),
        "pooler_b": zeros((1, HIDDEN)),
        # self.bert.final_classifier = ModuleList([Linear(H, C_i)])
        "cls_w": [nrm((HIDDEN, c)) for c in TASKS_NUM_CLASSES],
        "cls_b": [zeros((1, c)) for c in TASKS_NUM_CLASSES],
    }
    for _ in range(NUM_LAYERS):
        params["layers"].append(
            {
                "wq": nrm((HIDDEN, HIDDEN)), "bq": zeros((1, HIDDEN)),
                "wk": nrm((HIDDEN, HIDDEN)), "bk": zeros((1, HIDDEN)),
                "wv": nrm((HIDDEN, HIDDEN)), "bv": zeros((1, HIDDEN)),
                "wo": nrm((HIDDEN, HIDDEN)), "bo": zeros((1, HIDDEN)),
                "ln1_g": jnp.ones((1, HIDDEN), jnp.float32), "ln1_b": zeros((1, HIDDEN)),
                "w1": nrm((HIDDEN, INTERMEDIATE)), "b1": zeros((1, INTERMEDIATE)),
                "w2": nrm((INTERMEDIATE, HIDDEN)), "b2": zeros((1, HIDDEN)),
                "ln2_g": jnp.ones((1, HIDDEN), jnp.float32), "ln2_b": zeros((1, HIDDEN)),
            }
        )
    return params


# ----------------------------- model wrapper -----------------------------------
class BertForMultiTaskPallas:
    """Pallas-TPU re-implementation of BertForMultiTask.forward (eval mode)."""

    def __init__(self, params):
        self.params = params
        self.classes = TASKS_NUM_CLASSES
        self.task_types = TASK_TYPES
        self.multilabel = MULTILABEL
        self.one_hot_labels = ONE_HOT_LABELS
        self.weights = WEIGHTS
        self.new_model = False  # uses self.bert.pooler, CLS-token pooling

        # --- build kernel-friendly layouts once ---
        layers = params["layers"]

        def stack(key):
            return jnp.stack([lp[key] for lp in layers])

        def fuse_qkv(lp, wkey_or_bkey):
            if wkey_or_bkey == "w":
                cat = jnp.concatenate([lp["wq"], lp["wk"], lp["wv"]], axis=1)
            else:
                cat = jnp.concatenate([lp["bq"], lp["bk"], lp["bv"]], axis=1)
            return jnp.pad(cat, ((0, 0), (0, QKV_PAD - 3 * HIDDEN)))

        self._stacked = {
            # fused, lane-dense QKV projection (weights bf16, bias f32)
            "wqkv": jnp.stack([fuse_qkv(lp, "w") for lp in layers]).astype(jnp.bfloat16),
            "bqkv": jnp.stack([fuse_qkv(lp, "b") for lp in layers]),
            "wo": stack("wo").astype(jnp.bfloat16), "bo": stack("bo"),
            "ln1_g": stack("ln1_g"), "ln1_b": stack("ln1_b"),
            "w1": stack("w1").astype(jnp.bfloat16), "b1": stack("b1"),
            "w2": stack("w2").astype(jnp.bfloat16), "b2": stack("b2"),
            "ln2_g": stack("ln2_g"), "ln2_b": stack("ln2_b"),
        }

        # embedding tables (word table row-padded to 128 for the one-hot gather)
        self._tables = {
            "word": jnp.pad(params["word_emb"], ((0, VOCAB_PAD - VOCAB), (0, 0))),
            "pos": params["pos_emb"],
            "type": params["type_emb"],
        }

        def pad_lanes(a):
            return jnp.pad(a, ((0, 0), (0, LOGIT_PAD - a.shape[-1])))

        self._head = {
            "emb_ln_g": params["emb_ln_g"], "emb_ln_b": params["emb_ln_b"],
            "pooler_w": params["pooler_w"].astype(jnp.bfloat16),
            "pooler_b": params["pooler_b"],
            "cls_w": [pad_lanes(w).astype(jnp.bfloat16) for w in params["cls_w"]],
            "cls_b": [pad_lanes(b) for b in params["cls_b"]],
        }

    # --- single fused encoder + both heads ---
    def _run(self, input_ids, attention_mask, token_type_ids, cls_labels, seq_labels):
        if token_type_ids is None:
            token_type_ids = jnp.zeros_like(input_ids)
        B, S = input_ids.shape
        compute_cls = cls_labels is not None
        compute_seq = seq_labels is not None
        cls_lab = (jnp.asarray(cls_labels).reshape(-1, 1).astype(jnp.int32)
                   if compute_cls else jnp.zeros((B, 1), jnp.int32))
        seq_lab = (jnp.asarray(seq_labels).reshape(-1, 1).astype(jnp.int32)
                   if compute_seq else jnp.zeros((B * S, 1), jnp.int32))
        cls_logits_pad, seq_logits_pad, scalars = _run_model(
            input_ids, attention_mask, token_type_ids, cls_lab, seq_lab,
            self._tables, self._stacked, self._head,
            compute_cls_loss=compute_cls, compute_seq_loss=compute_seq)
        c0, c1 = self.classes
        cls_logits = cls_logits_pad[:, :c0]
        seq_logits = seq_logits_pad.reshape(B, S, LOGIT_PAD)[:, :, :c1]
        return cls_logits, scalars[0, 0], seq_logits, scalars[0, 1]

    # --- original forward(task_id, ...) semantics ---
    def forward(self, task_id, input_ids, attention_mask, token_type_ids, labels=None):
        name = self.task_types[task_id]
        if name in ("sequence_labeling", "multiple_choice"):
            input_ids = input_ids.reshape(-1, input_ids.shape[-1])
            attention_mask = attention_mask.reshape(-1, attention_mask.shape[-1])
            if token_type_ids is not None:
                token_type_ids = token_type_ids.reshape(-1, token_type_ids.shape[-1])
        cls_labels = labels if name == "classification" else None
        seq_labels = labels if name == "sequence_labeling" else None
        cls_logits, cls_loss, seq_logits, seq_loss = self._run(
            input_ids, attention_mask, token_type_ids, cls_labels, seq_labels)
        if name == "classification":
            # CrossEntropyLoss (not multilabel / focal / one-hot, weight=None)
            return (cls_loss, cls_logits) if labels is not None else cls_logits
        if name == "sequence_labeling":
            return (seq_loss, seq_logits) if labels is not None else seq_logits
        # TODO(synk): regression / multiple_choice / binary_head / focal / BCE heads not wired.
        raise Exception(f"Unsupported name {name}")

    # --- shared-encoder path: one fused pallas_call for every task ---
    def forward_multitask(self, input_ids, attention_mask, token_type_ids, labels_per_task):
        cls_labels, seq_labels = labels_per_task
        cls_logits, cls_loss, seq_logits, seq_loss = self._run(
            input_ids, attention_mask, token_type_ids, cls_labels, seq_labels)
        out = []
        out.append((cls_loss, cls_logits) if cls_labels is not None else cls_logits)
        out.append((seq_loss, seq_logits) if seq_labels is not None else seq_logits)
        return out


# ----------------------------- main --------------------------------------------
if __name__ == "__main__":
    params = init_params()
    model = BertForMultiTaskPallas(params)

    kin = jax.random.split(jax.random.PRNGKey(0), 3)
    input_ids = jax.random.randint(kin[0], (BATCH, SEQ), 0, VOCAB, dtype=jnp.int32)
    attention_mask = jnp.concatenate(
        [jnp.ones((BATCH, SEQ - 2), jnp.int32),
         jnp.array([[1, 1], [0, 0]], jnp.int32)], axis=1
    )
    token_type_ids = jnp.zeros((BATCH, SEQ), jnp.int32)
    labels_cls = jax.random.randint(kin[1], (BATCH,), 0, TASKS_NUM_CLASSES[0],
                                    dtype=jnp.int32)

    # Single fused pallas_call: shared encoder + both task heads.
    #   task 0: classification with labels -> (loss, logits (B, 3))
    #   task 1: sequence labeling, no labels -> logits (B, S, 5)  (loss pass skipped)
    results = model.forward_multitask(input_ids, attention_mask, token_type_ids,
                                      [labels_cls, None])
    loss0, logits0 = results[0]
    logits1 = results[1]

    jax.block_until_ready((loss0, logits0, logits1))
    assert logits0.shape == (BATCH, TASKS_NUM_CLASSES[0])
    assert logits1.shape == (BATCH, SEQ, TASKS_NUM_CLASSES[1])
    assert loss0.shape == ()
    assert bool(jnp.isfinite(loss0))
    print("KERNEL_OK")
</pallas_src>

<mosaic_0001>
module attributes {stable_mosaic.version = 11 : i64} {
  func.func @_fused_forward_kernel(%arg0: memref<16x1xi32, #tpu.memory_space<vmem>>, %arg1: memref<16x1xi32, #tpu.memory_space<vmem>>, %arg2: memref<2x8xf32, #tpu.memory_space<vmem>>, %arg3: memref<2x1xi32, #tpu.memory_space<vmem>>, %arg4: memref<16x1xi32, #tpu.memory_space<vmem>>, %arg5: memref<128x32xf32, #tpu.memory_space<vmem>>, %arg6: memref<64x32xf32, #tpu.memory_space<vmem>>, %arg7: memref<2x32xf32, #tpu.memory_space<vmem>>, %arg8: memref<1x32xf32, #tpu.memory_space<vmem>>, %arg9: memref<1x32xf32, #tpu.memory_space<vmem>>, %arg10: memref<2x32x128xbf16, #tpu.memory_space<vmem>>, %arg11: memref<2x1x128xf32, #tpu.memory_space<vmem>>, %arg12: memref<2x32x32xbf16, #tpu.memory_space<vmem>>, %arg13: memref<2x1x32xf32, #tpu.memory_space<vmem>>, %arg14: memref<2x1x32xf32, #tpu.memory_space<vmem>>, %arg15: memref<2x1x32xf32, #tpu.memory_space<vmem>>, %arg16: memref<2x32x64xbf16, #tpu.memory_space<vmem>>, %arg17: memref<2x1x64xf32, #tpu.memory_space<vmem>>, %arg18: memref<2x64x32xbf16, #tpu.memory_space<vmem>>, %arg19: memref<2x1x32xf32, #tpu.memory_space<vmem>>, %arg20: memref<2x1x32xf32, #tpu.memory_space<vmem>>, %arg21: memref<2x1x32xf32, #tpu.memory_space<vmem>>, %arg22: memref<32x32xbf16, #tpu.memory_space<vmem>>, %arg23: memref<1x32xf32, #tpu.memory_space<vmem>>, %arg24: memref<32x128xbf16, #tpu.memory_space<vmem>>, %arg25: memref<1x128xf32, #tpu.memory_space<vmem>>, %arg26: memref<32x128xbf16, #tpu.memory_space<vmem>>, %arg27: memref<1x128xf32, #tpu.memory_space<vmem>>, %arg28: memref<2x128xf32, #tpu.memory_space<vmem>>, %arg29: memref<16x128xf32, #tpu.memory_space<vmem>>, %arg30: memref<1x128xf32, #tpu.memory_space<vmem>>) attributes {dimension_semantics = [], scalar_prefetch = 0 : i64, scratch_operands = 0 : i64, tpu.core_type = #tpu.core_type<tc>} {
    %c0 = arith.constant 0 : index
    %c0_0 = arith.constant 0 : index
    %0 = vector.load %arg0[%c0, %c0_0] : memref<16x1xi32, #tpu.memory_space<vmem>>, vector<16x1xi32>
    %1 = tpu.iota {dimensions = array<i32: 1>} : vector<16x128xi32>
    %2 = vector.broadcast %0 : vector<16x1xi32> to vector<16x128xi32>
    %3 = arith.cmpi eq, %1, %2 : vector<16x128xi32>
    %4 = arith.extui %3 : vector<16x128xi1> to vector<16x128xi32>
    %5 = arith.sitofp %4 : vector<16x128xi32> to vector<16x128xf32>
    %c0_1 = arith.constant 0 : index
    %c0_2 = arith.constant 0 : index
    %6 = vector.load %arg5[%c0_1, %c0_2] : memref<128x32xf32, #tpu.memory_space<vmem>>, vector<128x32xf32>
    %cst = arith.constant dense<0.000000e+00> : vector<16x32xf32>
    %7 = tpu.matmul %5, %6, %cst {dimension_numbers = #tpu.dot_dimension_numbers<[1], [0], [0], [1], [0, 0, 1, 1], [], []>} : vector<16x128xf32>, vector<128x32xf32>, vector<16x32xf32> -> vector<16x32xf32>
    %c0_3 = arith.constant 0 : index
    %c0_4 = arith.constant 0 : index
    %8 = vector.load %arg6[%c0_3, %c0_4] : memref<64x32xf32, #tpu.memory_space<vmem>>, vector<8x32xf32>
    %9 = vector.shape_cast %8 : vector<8x32xf32> to vector<1x8x32xf32>
    %10 = vector.shape_cast %9 : vector<1x8x32xf32> to vector<1x8x32xf32>
    %11 = vector.broadcast %10 : vector<1x8x32xf32> to vector<2x8x32xf32>
    %12 = vector.shape_cast %11 : vector<2x8x32xf32> to vector<16x32xf32>
    %c0_5 = arith.constant 0 : index
    %c0_6 = arith.constant 0 : index
    %13 = vector.load %arg1[%c0_5, %c0_6] : memref<16x1xi32, #tpu.memory_space<vmem>>, vector<16x1xi32>
    %c0_i32 = arith.constant 0 : i32
    %14 = vector.broadcast %c0_i32 : i32 to vector<16x1xi32>
    %15 = arith.cmpi eq, %13, %14 : vector<16x1xi32>
    %c0_7 = arith.constant 0 : index
    %c0_8 = arith.constant 0 : index
    %16 = vector.load %arg7[%c0_7, %c0_8] : memref<2x32xf32, #tpu.memory_space<vmem>>, vector<1x32xf32>
    %c1 = arith.constant 1 : index
    %c0_9 = arith.constant 0 : index
    %17 = vector.load %arg7[%c1, %c0_9] : memref<2x32xf32, #tpu.memory_space<vmem>>, vector<1x32xf32>
    %18 = vector.shape_cast %15 : vector<16x1xi1> to vector<16x1xi1>
    %19 = vector.broadcast %18 : vector<16x1xi1> to vector<16x32xi1>
    %20 = vector.shape_cast %16 : vector<1x32xf32> to vector<1x32xf32>
    %21 = vector.broadcast %20 : vector<1x32xf32> to vector<16x32xf32>
    %22 = vector.shape_cast %17 : vector<1x32xf32> to vector<1x32xf32>
    %23 = vector.broadcast %22 : vector<1x32xf32> to vector<16x32xf32>
    %24 = arith.select %19, %21, %23 : vector<16x32xi1>, vector<16x32xf32>
    %25 = arith.addf %7, %12 : vector<16x32xf32>
    %26 = arith.addf %25, %24 : vector<16x32xf32>
    %c0_10 = arith.constant 0 : index
    %c0_11 = arith.constant 0 : index
    %27 = vector.load %arg8[%c0_10, %c0_11] : memref<1x32xf32, #tpu.memory_space<vmem>>, vector<1x32xf32>
    %c0_12 = arith.constant 0 : index
    %c0_13 = arith.constant 0 : index
    %28 = vector.load %arg9[%c0_12, %c0_13] : memref<1x32xf32, #tpu.memory_space<vmem>>, vector<1x32xf32>
    %cst_14 = arith.constant dense<0.000000e+00> : vector<16xf32>
    %29 = vector.multi_reduction <add>, %26, %cst_14 [1] : vector<16x32xf32> to vector<16xf32>
    %30 = vector.shape_cast %29 : vector<16xf32> to vector<16x1xf32>
    %cst_15 = arith.constant 3.200000e+01 : f32
    %31 = vector.broadcast %cst_15 : f32 to vector<16x1xf32>
    %32 = arith.divf %30, %31 : vector<16x1xf32>
    %33 = vector.broadcast %32 : vector<16x1xf32> to vector<16x32xf32>
    %34 = arith.subf %26, %33 : vector<16x32xf32>
    %35 = arith.mulf %34, %34 : vector<16x32xf32>
    %cst_16 = arith.constant dense<0.000000e+00> : vector<16xf32>
    %36 = vector.multi_reduction <add>, %35, %cst_16 [1] : vector<16x32xf32> to vector<16xf32>
    %37 = vector.shape_cast %36 : vector<16xf32> to vector<16x1xf32>
    %cst_17 = arith.constant 3.200000e+01 : f32
    %38 = vector.broadcast %cst_17 : f32 to vector<16x1xf32>
    %39 = arith.divf %37, %38 : vector<16x1xf32>
    %40 = vector.broadcast %32 : vector<16x1xf32> to vector<16x32xf32>
    %41 = arith.subf %26, %40 : vector<16x32xf32>
    %cst_18 = arith.constant 9.99999996E-13 : f32
    %42 = vector.broadcast %cst_18 : f32 to vector<16x1xf32>
    %43 = arith.addf %39, %42 : vector<16x1xf32>
    %44 = math.rsqrt %43 : vector<16x1xf32>
    %45 = vector.broadcast %44 : vector<16x1xf32> to vector<16x32xf32>
    %46 = arith.mulf %41, %45 : vector<16x32xf32>
    %47 = vector.broadcast %27 : vector<1x32xf32> to vector<16x32xf32>
    %48 = arith.mulf %46, %47 : vector<16x32xf32>
    %49 = vector.broadcast %28 : vector<1x32xf32> to vector<16x32xf32>
    %50 = arith.addf %48, %49 : vector<16x32xf32>
    %c0_19 = arith.constant 0 : index
    %c0_20 = arith.constant 0 : index
    %51 = vector.load %arg2[%c0_19, %c0_20] : memref<2x8xf32, #tpu.memory_space<vmem>>, vector<2x8xf32>
    %cst_21 = arith.constant 1.000000e+00 : f32
    %52 = vector.broadcast %cst_21 : f32 to vector<2x8xf32>
    %53 = arith.subf %51, %52 : vector<2x8xf32>
    %cst_22 = arith.constant 1.000000e+04 : f32
    %54 = vector.broadcast %cst_22 : f32 to vector<2x8xf32>
    %55 = arith.mulf %53, %54 : vector<2x8xf32>
    %56 = vector.shape_cast %55 : vector<2x8xf32> to vector<1x2x8xf32>
    %57 = vector.shape_cast %56 : vector<1x2x8xf32> to vector<1x2x8xf32>
    %58 = vector.broadcast %57 : vector<1x2x8xf32> to vector<2x2x8xf32>
    %59 = vector.shape_cast %58 : vector<2x2x8xf32> to vector<4x8xf32>
    %60 = vector.shape_cast %59 : vector<4x8xf32> to vector<4x1x8xf32>
    %61 = vector.shape_cast %60 : vector<4x1x8xf32> to vector<4x1x8xf32>
    %62 = vector.broadcast %61 : vector<4x1x8xf32> to vector<4x8x8xf32>
    %c0_23 = arith.constant 0 : index
    %c0_24 = arith.constant 0 : index
    %c0_25 = arith.constant 0 : index
    %63 = vector.load %arg10[%c0_23, %c0_24, %c0_25] : memref<2x32x128xbf16, #tpu.memory_space<vmem>>, vector<1x32x128xbf16>
    %64 = vector.shape_cast %63 : vector<1x32x128xbf16> to vector<32x128xbf16>
    %65 = arith.truncf %50 : vector<16x32xf32> to vector<16x32xbf16>
    %cst_26 = arith.constant dense<0.000000e+00> : vector<16x128xf32>
    %66 = tpu.matmul %65, %64, %cst_26 {dimension_numbers = #tpu.dot_dimension_numbers<[1], [0], [0], [1], [0, 0, 1, 1], [], []>} : vector<16x32xbf16>, vector<32x128xbf16>, vector<16x128xf32> -> vector<16x128xf32>
    %c0_27 = arith.constant 0 : index
    %c0_28 = arith.constant 0 : index
    %c0_29 = arith.constant 0 : index
    %67 = vector.load %arg11[%c0_27, %c0_28, %c0_29] : memref<2x1x128xf32, #tpu.memory_space<vmem>>, vector<1x1x128xf32>
    %68 = vector.shape_cast %67 : vector<1x1x128xf32> to vector<1x128xf32>
    %69 = vector.broadcast %68 : vector<1x128xf32> to vector<16x128xf32>
    %70 = arith.addf %66, %69 : vector<16x128xf32>
    %71 = vector.extract_strided_slice %70 {offsets = [0, 0], sizes = [16, 32], strides = [1, 1]} : vector<16x128xf32> to vector<16x32xf32>
    %72 = vector.extract_strided_slice %71 {offsets = [0, 0], sizes = [16, 16], strides = [1, 1]} : vector<16x32xf32> to vector<16x16xf32>
    %73 = vector.shape_cast %72 : vector<16x16xf32> to vector<2x8x16xf32>
    %74 = vector.extract_strided_slice %71 {offsets = [0, 16], sizes = [16, 16], strides = [1, 1]} : vector<16x32xf32> to vector<16x16xf32>
    %75 = vector.shape_cast %74 : vector<16x16xf32> to vector<2x8x16xf32>
    %76 = tpu.concatenate %73, %75 in 0 : vector<2x8x16xf32>, vector<2x8x16xf32> -> vector<4x8x16xf32>
    %77 = vector.extract_strided_slice %70 {offsets = [0, 32], sizes = [16, 32], strides = [1, 1]} : vector<16x128xf32> to vector<16x32xf32>
    %78 = vector.extract_strided_slice %77 {offsets = [0, 0], sizes = [16, 16], strides = [1, 1]} : vector<16x32xf32> to vector<16x16xf32>
    %79 = vector.shape_cast %78 : vector<16x16xf32> to vector<2x8x16xf32>
    %80 = vector.extract_strided_slice %77 {offsets = [0, 16], sizes = [16, 16], strides = [1, 1]} : vector<16x32xf32> to vector<16x16xf32>
    %81 = vector.shape_cast %80 : vector<16x16xf32> to vector<2x8x16xf32>
    %82 = tpu.concatenate %79, %81 in 0 : vector<2x8x16xf32>, vector<2x8x16xf32> -> vector<4x8x16xf32>
    %83 = vector.extract_strided_slice %70 {offsets = [0, 64], sizes = [16, 32], strides = [1, 1]} : vector<16x128xf32> to vector<16x32xf32>
    %84 = vector.extract_strided_slice %83 {offsets = [0, 0], sizes = [16, 16], strides = [1, 1]} : vector<16x32xf32> to vector<16x16xf32>
    %85 = vector.shape_cast %84 : vector<16x16xf32> to vector<2x8x16xf32>
    %86 = vector.extract_strided_slice %83 {offsets = [0, 16], sizes = [16, 16], strides = [1, 1]} : vector<16x32xf32> to vector<16x16xf32>
    %87 = vector.shape_cast %86 : vector<16x16xf32> to vector<2x8x16xf32>
    %88 = tpu.concatenate %85, %87 in 0 : vector<2x8x16xf32>, vector<2x8x16xf32> -> vector<4x8x16xf32>
    %89 = arith.truncf %76 : vector<4x8x16xf32> to vector<4x8x16xbf16>
    %90 = arith.truncf %82 : vector<4x8x16xf32> to vector<4x8x16xbf16>
    "tpu.trace_start"() <{level = 10 : i32, message = "bqd,bkd->bqk"}> : () -> ()
    %cst_30 = arith.constant dense<0.000000e+00> : vector<4x8x8xf32>
    %91 = tpu.matmul %89, %90, %cst_30 {dimension_numbers = #tpu.dot_dimension_numbers<[2], [2], [1], [1], [0, 0, 0, 1, 1, 1], [0], [0]>} : vector<4x8x16xbf16>, vector<4x8x16xbf16>, vector<4x8x8xf32> -> vector<4x8x8xf32>
    "tpu.trace_stop"() : () -> ()
    %cst_31 = arith.constant 2.500000e-01 : f32
    %92 = vector.broadcast %cst_31 : f32 to vector<4x8x8xf32>
    %93 = arith.mulf %91, %92 : vector<4x8x8xf32>
    %94 = arith.addf %93, %62 : vector<4x8x8xf32>
    %cst_32 = arith.constant dense<0xFF800000> : vector<4x8xf32>
    %95 = vector.multi_reduction <maximumf>, %94, %cst_32 [2] : vector<4x8x8xf32> to vector<4x8xf32>
    %96 = vector.shape_cast %95 : vector<4x8xf32> to vector<4x8x1xf32>
    %97 = vector.broadcast %96 : vector<4x8x1xf32> to vector<4x8x8xf32>
    %98 = arith.subf %94, %97 : vector<4x8x8xf32>
    %99 = math.exp %98 : vector<4x8x8xf32>
    %cst_33 = arith.constant dense<0.000000e+00> : vector<4x8xf32>
    %100 = vector.multi_reduction <add>, %99, %cst_33 [2] : vector<4x8x8xf32> to vector<4x8xf32>
    %101 = vector.shape_cast %100 : vector<4x8xf32> to vector<4x8x1xf32>
    %102 = tpu.reciprocal %101 {approx = true} : vector<4x8x1xf32> -> vector<4x8x1xf32>
    %103 = vector.broadcast %102 : vector<4x8x1xf32> to vector<4x8x8xf32>
    %104 = arith.mulf %99, %103 : vector<4x8x8xf32>
    %105 = arith.truncf %104 : vector<4x8x8xf32> to vector<4x8x8xbf16>
    %106 = arith.truncf %88 : vector<4x8x16xf32> to vector<4x8x16xbf16>
    "tpu.trace_start"() <{level = 10 : i32, message = "bqk,bkd->bqd"}> : () -> ()
    %cst_34 = arith.constant dense<0.000000e+00> : vector<4x8x16xf32>
    %107 = tpu.matmul %105, %106, %cst_34 {dimension_numbers = #tpu.dot_dimension_numbers<[2], [1], [1], [2], [0, 0, 0, 1, 1, 2], [0], [0]>} : vector<4x8x8xbf16>, vector<4x8x16xbf16>, vector<4x8x16xf32> -> vector<4x8x16xf32>
    "tpu.trace_stop"() : () -> ()
    %108 = vector.extract_strided_slice %107 {offsets = [0, 0, 0], sizes = [2, 8, 16], strides = [1, 1, 1]} : vector<4x8x16xf32> to vector<2x8x16xf32>
    %109 = vector.shape_cast %108 : vector<2x8x16xf32> to vector<16x16xf32>
    %110 = vector.extract_strided_slice %107 {offsets = [2, 0, 0], sizes = [2, 8, 16], strides = [1, 1, 1]} : vector<4x8x16xf32> to vector<2x8x16xf32>
    %111 = vector.shape_cast %110 : vector<2x8x16xf32> to vector<16x16xf32>
    %112 = tpu.concatenate %109, %111 in 1 : vector<16x16xf32>, vector<16x16xf32> -> vector<16x32xf32>
    %c0_35 = arith.constant 0 : index
    %c0_36 = arith.constant 0 : index
    %c0_37 = arith.constant 0 : index
    %113 = vector.load %arg12[%c0_35, %c0_36, %c0_37] : memref<2x32x32xbf16, #tpu.memory_space<vmem>>, vector<1x32x32xbf16>
    %114 = vector.shape_cast %113 : vector<1x32x32xbf16> to vector<32x32xbf16>
    %115 = arith.truncf %112 : vector<16x32xf32> to vector<16x32xbf16>
    %cst_38 = arith.constant dense<0.000000e+00> : vector<16x32xf32>
    %116 = tpu.matmul %115, %114, %cst_38 {dimension_numbers = #tpu.dot_dimension_numbers<[1], [0], [0], [1], [0, 0, 1, 1], [], []>} : vector<16x32xbf16>, vector<32x32xbf16>, vector<16x32xf32> -> vector<16x32xf32>
    %c0_39 = arith.constant 0 : index
    %c0_40 = arith.constant 0 : index
    %c0_41 = arith.constant 0 : index
    %117 = vector.load %arg13[%c0_39, %c0_40, %c0_41] : memref<2x1x32xf32, #tpu.memory_space<vmem>>, vector<1x1x32xf32>
    %118 = vector.shape_cast %117 : vector<1x1x32xf32> to vector<1x32xf32>
    %119 = vector.broadcast %118 : vector<1x32xf32> to vector<16x32xf32>
    %120 = arith.addf %116, %119 : vector<16x32xf32>
    %121 = arith.addf %50, %120 : vector<16x32xf32>
    %c0_42 = arith.constant 0 : index
    %c0_43 = arith.constant 0 : index
    %c0_44 = arith.constant 0 : index
    %122 = vector.load %arg14[%c0_42, %c0_43, %c0_44] : memref<2x1x32xf32, #tpu.memory_space<vmem>>, vector<1x1x32xf32>
    %123 = vector.shape_cast %122 : vector<1x1x32xf32> to vector<1x32xf32>
    %c0_45 = arith.constant 0 : index
    %c0_46 = arith.constant 0 : index
    %c0_47 = arith.constant 0 : index
    %124 = vector.load %arg15[%c0_45, %c0_46, %c0_47] : memref<2x1x32xf32, #tpu.memory_space<vmem>>, vector<1x1x32xf32>
    %125 = vector.shape_cast %124 : vector<1x1x32xf32> to vector<1x32xf32>
    %cst_48 = arith.constant dense<0.000000e+00> : vector<16xf32>
    %126 = vector.multi_reduction <add>, %121, %cst_48 [1] : vector<16x32xf32> to vector<16xf32>
    %127 = vector.shape_cast %126 : vector<16xf32> to vector<16x1xf32>
    %cst_49 = arith.constant 3.200000e+01 : f32
    %128 = vector.broadcast %cst_49 : f32 to vector<16x1xf32>
    %129 = arith.divf %127, %128 : vector<16x1xf32>
    %130 = vector.broadcast %129 : vector<16x1xf32> to vector<16x32xf32>
    %131 = arith.subf %121, %130 : vector<16x32xf32>
    %132 = arith.mulf %131, %131 : vector<16x32xf32>
    %cst_50 = arith.constant dense<0.000000e+00> : vector<16xf32>
    %133 = vector.multi_reduction <add>, %132, %cst_50 [1] : vector<16x32xf32> to vector<16xf32>
    %134 = vector.shape_cast %133 : vector<16xf32> to vector<16x1xf32>
    %cst_51 = arith.constant 3.200000e+01 : f32
    %135 = vector.broadcast %cst_51 : f32 to vector<16x1xf32>
    %136 = arith.divf %134, %135 : vector<16x1xf32>
    %137 = vector.broadcast %129 : vector<16x1xf32> to vector<16x32xf32>
    %138 = arith.subf %121, %137 : vector<16x32xf32>
    %cst_52 = arith.constant 9.99999996E-13 : f32
    %139 = vector.broadcast %cst_52 : f32 to vector<16x1xf32>
    %140 = arith.addf %136, %139 : vector<16x1xf32>
    %141 = math.rsqrt %140 : vector<16x1xf32>
    %142 = vector.broadcast %141 : vector<16x1xf32> to vector<16x32xf32>
    %143 = arith.mulf %138, %142 : vector<16x32xf32>
    %144 = vector.broadcast %123 : vector<1x32xf32> to vector<16x32xf32>
    %145 = arith.mulf %143, %144 : vector<16x32xf32>
    %146 = vector.broadcast %125 : vector<1x32xf32> to vector<16x32xf32>
    %147 = arith.addf %145, %146 : vector<16x32xf32>
    %c0_53 = arith.constant 0 : index
    %c0_54 = arith.constant 0 : index
    %c0_55 = arith.constant 0 : index
    %148 = vector.load %arg16[%c0_53, %c0_54, %c0_55] : memref<2x32x64xbf16, #tpu.memory_space<vmem>>, vector<1x32x64xbf16>
    %149 = vector.shape_cast %148 : vector<1x32x64xbf16> to vector<32x64xbf16>
    %150 = arith.truncf %147 : vector<16x32xf32> to vector<16x32xbf16>
    %cst_56 = arith.constant dense<0.000000e+00> : vector<16x64xf32>
    %151 = tpu.matmul %150, %149, %cst_56 {dimension_numbers = #tpu.dot_dimension_numbers<[1], [0], [0], [1], [0, 0, 1, 1], [], []>} : vector<16x32xbf16>, vector<32x64xbf16>, vector<16x64xf32> -> vector<16x64xf32>
    %c0_57 = arith.constant 0 : index
    %c0_58 = arith.constant 0 : index
    %c0_59 = arith.constant 0 : index
    %152 = vector.load %arg17[%c0_57, %c0_58, %c0_59] : memref<2x1x64xf32, #tpu.memory_space<vmem>>, vector<1x1x64xf32>
    %153 = vector.shape_cast %152 : vector<1x1x64xf32> to vector<1x64xf32>
    %154 = vector.broadcast %153 : vector<1x64xf32> to vector<16x64xf32>
    %155 = arith.addf %151, %154 : vector<16x64xf32>
    %cst_60 = arith.constant 5.000000e-01 : f32
    %156 = vector.broadcast %cst_60 : f32 to vector<16x64xf32>
    %157 = arith.mulf %156, %155 : vector<16x64xf32>
    %cst_61 = arith.constant 4.471500e-02 : f32
    %158 = vector.broadcast %cst_61 : f32 to vector<16x64xf32>
    %159 = arith.mulf %158, %155 : vector<16x64xf32>
    %160 = arith.mulf %159, %155 : vector<16x64xf32>
    %161 = arith.mulf %160, %155 : vector<16x64xf32>
    %162 = arith.addf %155, %161 : vector<16x64xf32>
    %cst_62 = arith.constant 0.797884583 : f32
    %163 = vector.broadcast %cst_62 : f32 to vector<16x64xf32>
    %164 = arith.mulf %163, %162 : vector<16x64xf32>
    %165 = math.tanh %164 : vector<16x64xf32>
    %cst_63 = arith.constant 1.000000e+00 : f32
    %166 = vector.broadcast %cst_63 : f32 to vector<16x64xf32>
    %167 = arith.addf %166, %165 : vector<16x64xf32>
    %168 = arith.mulf %157, %167 : vector<16x64xf32>
    %c0_64 = arith.constant 0 : index
    %c0_65 = arith.constant 0 : index
    %c0_66 = arith.constant 0 : index
    %169 = vector.load %arg18[%c0_64, %c0_65, %c0_66] : memref<2x64x32xbf16, #tpu.memory_space<vmem>>, vector<1x64x32xbf16>
    %170 = vector.shape_cast %169 : vector<1x64x32xbf16> to vector<64x32xbf16>
    %171 = arith.truncf %168 : vector<16x64xf32> to vector<16x64xbf16>
    %cst_67 = arith.constant dense<0.000000e+00> : vector<16x32xf32>
    %172 = tpu.matmul %171, %170, %cst_67 {dimension_numbers = #tpu.dot_dimension_numbers<[1], [0], [0], [1], [0, 0, 1, 1], [], []>} : vector<16x64xbf16>, vector<64x32xbf16>, vector<16x32xf32> -> vector<16x32xf32>
    %c0_68 = arith.constant 0 : index
    %c0_69 = arith.constant 0 : index
    %c0_70 = arith.constant 0 : index
    %173 = vector.load %arg19[%c0_68, %c0_69, %c0_70] : memref<2x1x32xf32, #tpu.memory_space<vmem>>, vector<1x1x32xf32>
    %174 = vector.shape_cast %173 : vector<1x1x32xf32> to vector<1x32xf32>
    %175 = vector.broadcast %174 : vector<1x32xf32> to vector<16x32xf32>
    %176 = arith.addf %172, %175 : vector<16x32xf32>
    %177 = arith.addf %147, %176 : vector<16x32xf32>
    %c0_71 = arith.constant 0 : index
    %c0_72 = arith.constant 0 : index
    %c0_73 = arith.constant 0 : index
    %178 = vector.load %arg20[%c0_71, %c0_72, %c0_73] : memref<2x1x32xf32, #tpu.memory_space<vmem>>, vector<1x1x32xf32>
    %179 = vector.shape_cast %178 : vector<1x1x32xf32> to vector<1x32xf32>
    %c0_74 = arith.constant 0 : index
    %c0_75 = arith.constant 0 : index
    %c0_76 = arith.constant 0 : index
    %180 = vector.load %arg21[%c0_74, %c0_75, %c0_76] : memref<2x1x32xf32, #tpu.memory_space<vmem>>, vector<1x1x32xf32>
    %181 = vector.shape_cast %180 : vector<1x1x32xf32> to vector<1x32xf32>
    %cst_77 = arith.constant dense<0.000000e+00> : vector<16xf32>
    %182 = vector.multi_reduction <add>, %177, %cst_77 [1] : vector<16x32xf32> to vector<16xf32>
    %183 = vector.shape_cast %182 : vector<16xf32> to vector<16x1xf32>
    %cst_78 = arith.constant 3.200000e+01 : f32
    %184 = vector.broadcast %cst_78 : f32 to vector<16x1xf32>
    %185 = arith.divf %183, %184 : vector<16x1xf32>
    %186 = vector.broadcast %185 : vector<16x1xf32> to vector<16x32xf32>
    %187 = arith.subf %177, %186 : vector<16x32xf32>
    %188 = arith.mulf %187, %187 : vector<16x32xf32>
    %cst_79 = arith.constant dense<0.000000e+00> : vector<16xf32>
    %189 = vector.multi_reduction <add>, %188, %cst_79 [1] : vector<16x32xf32> to vector<16xf32>
    %190 = vector.shape_cast %189 : vector<16xf32> to vector<16x1xf32>
    %cst_80 = arith.constant 3.200000e+01 : f32
    %191 = vector.broadcast %cst_80 : f32 to vector<16x1xf32>
    %192 = arith.divf %190, %191 : vector<16x1xf32>
    %193 = vector.broadcast %185 : vector<16x1xf32> to vector<16x32xf32>
    %194 = arith.subf %177, %193 : vector<16x32xf32>
    %cst_81 = arith.constant 9.99999996E-13 : f32
    %195 = vector.broadcast %cst_81 : f32 to vector<16x1xf32>
    %196 = arith.addf %192, %195 : vector<16x1xf32>
    %197 = math.rsqrt %196 : vector<16x1xf32>
    %198 = vector.broadcast %197 : vector<16x1xf32> to vector<16x32xf32>
    %199 = arith.mulf %194, %198 : vector<16x32xf32>
    %200 = vector.broadcast %179 : vector<1x32xf32> to vector<16x32xf32>
    %201 = arith.mulf %199, %200 : vector<16x32xf32>
    %202 = vector.broadcast %181 : vector<1x32xf32> to vector<16x32xf32>
    %203 = arith.addf %201, %202 : vector<16x32xf32>
    %c1_82 = arith.constant 1 : index
    %c0_83 = arith.constant 0 : index
    %c0_84 = arith.constant 0 : index
    %204 = vector.load %arg10[%c1_82, %c0_83, %c0_84] : memref<2x32x128xbf16, #tpu.memory_space<vmem>>, vector<1x32x128xbf16>
    %205 = vector.shape_cast %204 : vector<1x32x128xbf16> to vector<32x128xbf16>
    %206 = arith.truncf %203 : vector<16x32xf32> to vector<16x32xbf16>
    %cst_85 = arith.constant dense<0.000000e+00> : vector<16x128xf32>
    %207 = tpu.matmul %206, %205, %cst_85 {dimension_numbers = #tpu.dot_dimension_numbers<[1], [0], [0], [1], [0, 0, 1, 1], [], []>} : vector<16x32xbf16>, vector<32x128xbf16>, vector<16x128xf32> -> vector<16x128xf32>
    %c1_86 = arith.constant 1 : index
    %c0_87 = arith.constant 0 : index
    %c0_88 = arith.constant 0 : index
    %208 = vector.load %arg11[%c1_86, %c0_87, %c0_88] : memref<2x1x128xf32, #tpu.memory_space<vmem>>, vector<1x1x128xf32>
    %209 = vector.shape_cast %208 : vector<1x1x128xf32> to vector<1x128xf32>
    %210 = vector.broadcast %209 : vector<1x128xf32> to vector<16x128xf32>
    %211 = arith.addf %207, %210 : vector<16x128xf32>
    %212 = vector.extract_strided_slice %211 {offsets = [0, 0], sizes = [16, 32], strides = [1, 1]} : vector<16x128xf32> to vector<16x32xf32>
    %213 = vector.extract_strided_slice %212 {offsets = [0, 0], sizes = [16, 16], strides = [1, 1]} : vector<16x32xf32> to vector<16x16xf32>
    %214 = vector.shape_cast %213 : vector<16x16xf32> to vector<2x8x16xf32>
    %215 = vector.extract_strided_slice %212 {offsets = [0, 16], sizes = [16, 16], strides = [1, 1]} : vector<16x32xf32> to vector<16x16xf32>
    %216 = vector.shape_cast %215 : vector<16x16xf32> to vector<2x8x16xf32>
    %217 = tpu.concatenate %214, %216 in 0 : vector<2x8x16xf32>, vector<2x8x16xf32> -> vector<4x8x16xf32>
    %218 = vector.extract_strided_slice %211 {offsets = [0, 32], sizes = [16, 32], strides = [1, 1]} : vector<16x128xf32> to vector<16x32xf32>
    %219 = vector.extract_strided_slice %218 {offsets = [0, 0], sizes = [16, 16], strides = [1, 1]} : vector<16x32xf32> to vector<16x16xf32>
    %220 = vector.shape_cast %219 : vector<16x16xf32> to vector<2x8x16xf32>
    %221 = vector.extract_strided_slice %218 {offsets = [0, 16], sizes = [16, 16], strides = [1, 1]} : vector<16x32xf32> to vector<16x16xf32>
    %222 = vector.shape_cast %221 : vector<16x16xf32> to vector<2x8x16xf32>
    %223 = tpu.concatenate %220, %222 in 0 : vector<2x8x16xf32>, vector<2x8x16xf32> -> vector<4x8x16xf32>
    %224 = vector.extract_strided_slice %211 {offsets = [0, 64], sizes = [16, 32], strides = [1, 1]} : vector<16x128xf32> to vector<16x32xf32>
    %225 = vector.extract_strided_slice %224 {offsets = [0, 0], sizes = [16, 16], strides = [1, 1]} : vector<16x32xf32> to vector<16x16xf32>
    %226 = vector.shape_cast %225 : vector<16x16xf32> to vector<2x8x16xf32>
    %227 = vector.extract_strided_slice %224 {offsets = [0, 16], sizes = [16, 16], strides = [1, 1]} : vector<16x32xf32> to vector<16x16xf32>
    %228 = vector.shape_cast %227 : vector<16x16xf32> to vector<2x8x16xf32>
    %229 = tpu.concatenate %226, %228 in 0 : vector<2x8x16xf32>, vector<2x8x16xf32> -> vector<4x8x16xf32>
    %230 = arith.truncf %217 : vector<4x8x16xf32> to vector<4x8x16xbf16>
    %231 = arith.truncf %223 : vector<4x8x16xf32> to vector<4x8x16xbf16>
    "tpu.trace_start"() <{level = 10 : i32, message = "bqd,bkd->bqk"}> : () -> ()
    %cst_89 = arith.constant dense<0.000000e+00> : vector<4x8x8xf32>
    %232 = tpu.matmul %230, %231, %cst_89 {dimension_numbers = #tpu.dot_dimension_numbers<[2], [2], [1], [1], [0, 0, 0, 1, 1, 1], [0], [0]>} : vector<4x8x16xbf16>, vector<4x8x16xbf16>, vector<4x8x8xf32> -> vector<4x8x8xf32>
    "tpu.trace_stop"() : () -> ()
    %cst_90 = arith.constant 2.500000e-01 : f32
    %233 = vector.broadcast %cst_90 : f32 to vector<4x8x8xf32>
    %234 = arith.mulf %232, %233 : vector<4x8x8xf32>
    %235 = arith.addf %234, %62 : vector<4x8x8xf32>
    %cst_91 = arith.constant dense<0xFF800000> : vector<4x8xf32>
    %236 = vector.multi_reduction <maximumf>, %235, %cst_91 [2] : vector<4x8x8xf32> to vector<4x8xf32>
    %237 = vector.shape_cast %236 : vector<4x8xf32> to vector<4x8x1xf32>
    %238 = vector.broadcast %237 : vector<4x8x1xf32> to vector<4x8x8xf32>
    %239 = arith.subf %235, %238 : vector<4x8x8xf32>
    %240 = math.exp %239 : vector<4x8x8xf32>
    %cst_92 = arith.constant dense<0.000000e+00> : vector<4x8xf32>
    %241 = vector.multi_reduction <add>, %240, %cst_92 [2] : vector<4x8x8xf32> to vector<4x8xf32>
    %242 = vector.shape_cast %241 : vector<4x8xf32> to vector<4x8x1xf32>
    %243 = tpu.reciprocal %242 {approx = true} : vector<4x8x1xf32> -> vector<4x8x1xf32>
    %244 = vector.broadcast %243 : vector<4x8x1xf32> to vector<4x8x8xf32>
    %245 = arith.mulf %240, %244 : vector<4x8x8xf32>
    %246 = arith.truncf %245 : vector<4x8x8xf32> to vector<4x8x8xbf16>
    %247 = arith.truncf %229 : vector<4x8x16xf32> to vector<4x8x16xbf16>
    "tpu.trace_start"() <{level = 10 : i32, message = "bqk,bkd->bqd"}> : () -> ()
    %cst_93 = arith.constant dense<0.000000e+00> : vector<4x8x16xf32>
    %248 = tpu.matmul %246, %247, %cst_93 {dimension_numbers = #tpu.dot_dimension_numbers<[2], [1], [1], [2], [0, 0, 0, 1, 1, 2], [0], [0]>} : vector<4x8x8xbf16>, vector<4x8x16xbf16>, vector<4x8x16xf32> -> vector<4x8x16xf32>
    "tpu.trace_stop"() : () -> ()
    %249 = vector.extract_strided_slice %248 {offsets = [0, 0, 0], sizes = [2, 8, 16], strides = [1, 1, 1]} : vector<4x8x16xf32> to vector<2x8x16xf32>
    %250 = vector.shape_cast %249 : vector<2x8x16xf32> to vector<16x16xf32>
    %251 = vector.extract_strided_slice %248 {offsets = [2, 0, 0], sizes = [2, 8, 16], strides = [1, 1, 1]} : vector<4x8x16xf32> to vector<2x8x16xf32>
    %252 = vector.shape_cast %251 : vector<2x8x16xf32> to vector<16x16xf32>
    %253 = tpu.concatenate %250, %252 in 1 : vector<16x16xf32>, vector<16x16xf32> -> vector<16x32xf32>
    %c1_94 = arith.constant 1 : index
    %c0_95 = arith.constant 0 : index
    %c0_96 = arith.constant 0 : index
    %254 = vector.load %arg12[%c1_94, %c0_95, %c0_96] : memref<2x32x32xbf16, #tpu.memory_space<vmem>>, vector<1x32x32xbf16>
    %255 = vector.shape_cast %254 : vector<1x32x32xbf16> to vector<32x32xbf16>
    %256 = arith.truncf %253 : vector<16x32xf32> to vector<16x32xbf16>
    %cst_97 = arith.constant dense<0.000000e+00> : vector<16x32xf32>
    %257 = tpu.matmul %256, %255, %cst_97 {dimension_numbers = #tpu.dot_dimension_numbers<[1], [0], [0], [1], [0, 0, 1, 1], [], []>} : vector<16x32xbf16>, vector<32x32xbf16>, vector<16x32xf32> -> vector<16x32xf32>
    %c1_98 = arith.constant 1 : index
    %c0_99 = arith.constant 0 : index
    %c0_100 = arith.constant 0 : index
    %258 = vector.load %arg13[%c1_98, %c0_99, %c0_100] : memref<2x1x32xf32, #tpu.memory_space<vmem>>, vector<1x1x32xf32>
    %259 = vector.shape_cast %258 : vector<1x1x32xf32> to vector<1x32xf32>
    %260 = vector.broadcast %259 : vector<1x32xf32> to vector<16x32xf32>
    %261 = arith.addf %257, %260 : vector<16x32xf32>
    %262 = arith.addf %203, %261 : vector<16x32xf32>
    %c1_101 = arith.constant 1 : index
    %c0_102 = arith.constant 0 : index
    %c0_103 = arith.constant 0 : index
    %263 = vector.load %arg14[%c1_101, %c0_102, %c0_103] : memref<2x1x32xf32, #tpu.memory_space<vmem>>, vector<1x1x32xf32>
    %264 = vector.shape_cast %263 : vector<1x1x32xf32> to vector<1x32xf32>
    %c1_104 = arith.constant 1 : index
    %c0_105 = arith.constant 0 : index
    %c0_106 = arith.constant 0 : index
    %265 = vector.load %arg15[%c1_104, %c0_105, %c0_106] : memref<2x1x32xf32, #tpu.memory_space<vmem>>, vector<1x1x32xf32>
    %266 = vector.shape_cast %265 : vector<1x1x32xf32> to vector<1x32xf32>
    %cst_107 = arith.constant dense<0.000000e+00> : vector<16xf32>
    %267 = vector.multi_reduction <add>, %262, %cst_107 [1] : vector<16x32xf32> to vector<16xf32>
    %268 = vector.shape_cast %267 : vector<16xf32> to vector<16x1xf32>
    %cst_108 = arith.constant 3.200000e+01 : f32
    %269 = vector.broadcast %cst_108 : f32 to vector<16x1xf32>
    %270 = arith.divf %268, %269 : vector<16x1xf32>
    %271 = vector.broadcast %270 : vector<16x1xf32> to vector<16x32xf32>
    %272 = arith.subf %262, %271 : vector<16x32xf32>
    %273 = arith.mulf %272, %272 : vector<16x32xf32>
    %cst_109 = arith.constant dense<0.000000e+00> : vector<16xf32>
    %274 = vector.multi_reduction <add>, %273, %cst_109 [1] : vector<16x32xf32> to vector<16xf32>
    %275 = vector.shape_cast %274 : vector<16xf32> to vector<16x1xf32>
    %cst_110 = arith.constant 3.200000e+01 : f32
    %276 = vector.broadcast %cst_110 : f32 to vector<16x1xf32>
    %277 = arith.divf %275, %276 : vector<16x1xf32>
    %278 = vector.broadcast %270 : vector<16x1xf32> to vector<16x32xf32>
    %279 = arith.subf %262, %278 : vector<16x32xf32>
    %cst_111 = arith.constant 9.99999996E-13 : f32
    %280 = vector.broadcast %cst_111 : f32 to vector<16x1xf32>
    %281 = arith.addf %277, %280 : vector<16x1xf32>
    %282 = math.rsqrt %281 : vector<16x1xf32>
    %283 = vector.broadcast %282 : vector<16x1xf32> to vector<16x32xf32>
    %284 = arith.mulf %279, %283 : vector<16x32xf32>
    %285 = vector.broadcast %264 : vector<1x32xf32> to vector<16x32xf32>
    %286 = arith.mulf %284, %285 : vector<16x32xf32>
    %287 = vector.broadcast %266 : vector<1x32xf32> to vector<16x32xf32>
    %288 = arith.addf %286, %287 : vector<16x32xf32>
    %c1_112 = arith.constant 1 : index
    %c0_113 = arith.constant 0 : index
    %c0_114 = arith.constant 0 : index
    %289 = vector.load %arg16[%c1_112, %c0_113, %c0_114] : memref<2x32x64xbf16, #tpu.memory_space<vmem>>, vector<1x32x64xbf16>
    %290 = vector.shape_cast %289 : vector<1x32x64xbf16> to vector<32x64xbf16>
    %291 = arith.truncf %288 : vector<16x32xf32> to vector<16x32xbf16>
    %cst_115 = arith.constant dense<0.000000e+00> : vector<16x64xf32>
    %292 = tpu.matmul %291, %290, %cst_115 {dimension_numbers = #tpu.dot_dimension_numbers<[1], [0], [0], [1], [0, 0, 1, 1], [], []>} : vector<16x32xbf16>, vector<32x64xbf16>, vector<16x64xf32> -> vector<16x64xf32>
    %c1_116 = arith.constant 1 : index
    %c0_117 = arith.constant 0 : index
    %c0_118 = arith.constant 0 : index
    %293 = vector.load %arg17[%c1_116, %c0_117, %c0_118] : memref<2x1x64xf32, #tpu.memory_space<vmem>>, vector<1x1x64xf32>
    %294 = vector.shape_cast %293 : vector<1x1x64xf32> to vector<1x64xf32>
    %295 = vector.broadcast %294 : vector<1x64xf32> to vector<16x64xf32>
    %296 = arith.addf %292, %295 : vector<16x64xf32>
    %cst_119 = arith.constant 5.000000e-01 : f32
    %297 = vector.broadcast %cst_119 : f32 to vector<16x64xf32>
    %298 = arith.mulf %297, %296 : vector<16x64xf32>
    %cst_120 = arith.constant 4.471500e-02 : f32
    %299 = vector.broadcast %cst_120 : f32 to vector<16x64xf32>
    %300 = arith.mulf %299, %296 : vector<16x64xf32>
    %301 = arith.mulf %300, %296 : vector<16x64xf32>
    %302 = arith.mulf %301, %296 : vector<16x64xf32>
    %303 = arith.addf %296, %302 : vector<16x64xf32>
    %cst_121 = arith.constant 0.797884583 : f32
    %304 = vector.broadcast %cst_121 : f32 to vector<16x64xf32>
    %305 = arith.mulf %304, %303 : vector<16x64xf32>
    %306 = math.tanh %305 : vector<16x64xf32>
    %cst_122 = arith.constant 1.000000e+00 : f32
    %307 = vector.broadcast %cst_122 : f32 to vector<16x64xf32>
    %308 = arith.addf %307, %306 : vector<16x64xf32>
    %309 = arith.mulf %298, %308 : vector<16x64xf32>
    %c1_123 = arith.constant 1 : index
    %c0_124 = arith.constant 0 : index
    %c0_125 = arith.constant 0 : index
    %310 = vector.load %arg18[%c1_123, %c0_124, %c0_125] : memref<2x64x32xbf16, #tpu.memory_space<vmem>>, vector<1x64x32xbf16>
    %311 = vector.shape_cast %310 : vector<1x64x32xbf16> to vector<64x32xbf16>
    %312 = arith.truncf %309 : vector<16x64xf32> to vector<16x64xbf16>
    %cst_126 = arith.constant dense<0.000000e+00> : vector<16x32xf32>
    %313 = tpu.matmul %312, %311, %cst_126 {dimension_numbers = #tpu.dot_dimension_numbers<[1], [0], [0], [1], [0, 0, 1, 1], [], []>} : vector<16x64xbf16>, vector<64x32xbf16>, vector<16x32xf32> -> vector<16x32xf32>
    %c1_127 = arith.constant 1 : index
    %c0_128 = arith.constant 0 : index
    %c0_129 = arith.constant 0 : index
    %314 = vector.load %arg19[%c1_127, %c0_128, %c0_129] : memref<2x1x32xf32, #tpu.memory_space<vmem>>, vector<1x1x32xf32>
    %315 = vector.shape_cast %314 : vector<1x1x32xf32> to vector<1x32xf32>
    %316 = vector.broadcast %315 : vector<1x32xf32> to vector<16x32xf32>
    %317 = arith.addf %313, %316 : vector<16x32xf32>
    %318 = arith.addf %288, %317 : vector<16x32xf32>
    %c1_130 = arith.constant 1 : index
    %c0_131 = arith.constant 0 : index
    %c0_132 = arith.constant 0 : index
    %319 = vector.load %arg20[%c1_130, %c0_131, %c0_132] : memref<2x1x32xf32, #tpu.memory_space<vmem>>, vector<1x1x32xf32>
    %320 = vector.shape_cast %319 : vector<1x1x32xf32> to vector<1x32xf32>
    %c1_133 = arith.constant 1 : index
    %c0_134 = arith.constant 0 : index
    %c0_135 = arith.constant 0 : index
    %321 = vector.load %arg21[%c1_133, %c0_134, %c0_135] : memref<2x1x32xf32, #tpu.memory_space<vmem>>, vector<1x1x32xf32>
    %322 = vector.shape_cast %321 : vector<1x1x32xf32> to vector<1x32xf32>
    %cst_136 = arith.constant dense<0.000000e+00> : vector<16xf32>
    %323 = vector.multi_reduction <add>, %318, %cst_136 [1] : vector<16x32xf32> to vector<16xf32>
    %324 = vector.shape_cast %323 : vector<16xf32> to vector<16x1xf32>
    %cst_137 = arith.constant 3.200000e+01 : f32
    %325 = vector.broadcast %cst_137 : f32 to vector<16x1xf32>
    %326 = arith.divf %324, %325 : vector<16x1xf32>
    %327 = vector.broadcast %326 : vector<16x1xf32> to vector<16x32xf32>
    %328 = arith.subf %318, %327 : vector<16x32xf32>
    %329 = arith.mulf %328, %328 : vector<16x32xf32>
    %cst_138 = arith.constant dense<0.000000e+00> : vector<16xf32>
    %330 = vector.multi_reduction <add>, %329, %cst_138 [1] : vector<16x32xf32> to vector<16xf32>
    %331 = vector.shape_cast %330 : vector<16xf32> to vector<16x1xf32>
    %cst_139 = arith.constant 3.200000e+01 : f32
    %332 = vector.broadcast %cst_139 : f32 to vector<16x1xf32>
    %333 = arith.divf %331, %332 : vector<16x1xf32>
    %334 = vector.broadcast %326 : vector<16x1xf32> to vector<16x32xf32>
    %335 = arith.subf %318, %334 : vector<16x32xf32>
    %cst_140 = arith.constant 9.99999996E-13 : f32
    %336 = vector.broadcast %cst_140 : f32 to vector<16x1xf32>
    %337 = arith.addf %333, %336 : vector<16x1xf32>
    %338 = math.rsqrt %337 : vector<16x1xf32>
    %339 = vector.broadcast %338 : vector<16x1xf32> to vector<16x32xf32>
    %340 = arith.mulf %335, %339 : vector<16x32xf32>
    %341 = vector.broadcast %320 : vector<1x32xf32> to vector<16x32xf32>
    %342 = arith.mulf %340, %341 : vector<16x32xf32>
    %343 = vector.broadcast %322 : vector<1x32xf32> to vector<16x32xf32>
    %344 = arith.addf %342, %343 : vector<16x32xf32>
    %345 = vector.shape_cast %344 : vector<16x32xf32> to vector<2x8x32xf32>
    %346 = vector.extract_strided_slice %345 {offsets = [0, 0, 0], sizes = [2, 1, 32], strides = [1, 1, 1]} : vector<2x8x32xf32> to vector<2x1x32xf32>
    %347 = vector.shape_cast %346 : vector<2x1x32xf32> to vector<2x32xf32>
    %c0_141 = arith.constant 0 : index
    %c0_142 = arith.constant 0 : index
    %348 = vector.load %arg22[%c0_141, %c0_142] : memref<32x32xbf16, #tpu.memory_space<vmem>>, vector<32x32xbf16>
    %349 = arith.truncf %347 : vector<2x32xf32> to vector<2x32xbf16>
    %cst_143 = arith.constant dense<0.000000e+00> : vector<2x32xf32>
    %350 = tpu.matmul %349, %348, %cst_143 {dimension_numbers = #tpu.dot_dimension_numbers<[1], [0], [0], [1], [0, 0, 1, 1], [], []>} : vector<2x32xbf16>, vector<32x32xbf16>, vector<2x32xf32> -> vector<2x32xf32>
    %c0_144 = arith.constant 0 : index
    %c0_145 = arith.constant 0 : index
    %351 = vector.load %arg23[%c0_144, %c0_145] : memref<1x32xf32, #tpu.memory_space<vmem>>, vector<1x32xf32>
    %352 = vector.broadcast %351 : vector<1x32xf32> to vector<2x32xf32>
    %353 = arith.addf %350, %352 : vector<2x32xf32>
    %354 = math.tanh %353 : vector<2x32xf32>
    %c0_146 = arith.constant 0 : index
    %c0_147 = arith.constant 0 : index
    %355 = vector.load %arg24[%c0_146, %c0_147] : memref<32x128xbf16, #tpu.memory_space<vmem>>, vector<32x128xbf16>
    %356 = arith.truncf %354 : vector<2x32xf32> to vector<2x32xbf16>
    %cst_148 = arith.constant dense<0.000000e+00> : vector<2x128xf32>
    %357 = tpu.matmul %356, %355, %cst_148 {dimension_numbers = #tpu.dot_dimension_numbers<[1], [0], [0], [1], [0, 0, 1, 1], [], []>} : vector<2x32xbf16>, vector<32x128xbf16>, vector<2x128xf32> -> vector<2x128xf32>
    %c0_149 = arith.constant 0 : index
    %c0_150 = arith.constant 0 : index
    %358 = vector.load %arg25[%c0_149, %c0_150] : memref<1x128xf32, #tpu.memory_space<vmem>>, vector<1x128xf32>
    %359 = vector.broadcast %358 : vector<1x128xf32> to vector<2x128xf32>
    %360 = arith.addf %357, %359 : vector<2x128xf32>
    %c0_151 = arith.constant 0 : index
    %c0_152 = arith.constant 0 : index
    %361 = vector.load %arg28[%c0_151, %c0_152] : memref<2x128xf32, #tpu.memory_space<vmem>>, vector<2x128xf32>
    tpu.vector_store %arg28[%c0_151, %c0_152], %360 {strides = array<i32>} : memref<2x128xf32, #tpu.memory_space<vmem>>, vector<2x128xf32>,
    %c0_153 = arith.constant 0 : index
    %c0_154 = arith.constant 0 : index
    %362 = vector.load %arg3[%c0_153, %c0_154] : memref<2x1xi32, #tpu.memory_space<vmem>>, vector<2x1xi32>
    %363 = tpu.iota {dimensions = array<i32: 1>} : vector<2x128xi32>
    %c3_i32 = arith.constant 3 : i32
    %364 = vector.broadcast %c3_i32 : i32 to vector<2x128xi32>
    %365 = arith.cmpi slt, %363, %364 : vector<2x128xi32>
    %cst_155 = arith.constant -1.000000e+30 : f32
    %366 = vector.broadcast %cst_155 : f32 to vector<2x128xf32>
    %367 = arith.select %365, %360, %366 : vector<2x128xi1>, vector<2x128xf32>
    %cst_156 = arith.constant dense<0xFF800000> : vector<2xf32>
    %368 = vector.multi_reduction <maximumf>, %367, %cst_156 [1] : vector<2x128xf32> to vector<2xf32>
    %369 = vector.shape_cast %368 : vector<2xf32> to vector<2x1xf32>
    %370 = vector.broadcast %369 : vector<2x1xf32> to vector<2x128xf32>
    %371 = arith.subf %367, %370 : vector<2x128xf32>
    %372 = math.exp %371 : vector<2x128xf32>
    %cst_157 = arith.constant dense<0.000000e+00> : vector<2xf32>
    %373 = vector.multi_reduction <add>, %372, %cst_157 [1] : vector<2x128xf32> to vector<2xf32>
    %374 = vector.shape_cast %373 : vector<2xf32> to vector<2x1xf32>
    %375 = math.log %374 : vector<2x1xf32>
    %376 = arith.addf %369, %375 : vector<2x1xf32>
    %377 = vector.broadcast %376 : vector<2x1xf32> to vector<2x128xf32>
    %378 = arith.subf %360, %377 : vector<2x128xf32>
    %379 = vector.broadcast %362 : vector<2x1xi32> to vector<2x128xi32>
    %380 = arith.cmpi eq, %363, %379 : vector<2x128xi32>
    %cst_158 = arith.constant 0.000000e+00 : f32
    %381 = vector.broadcast %cst_158 : f32 to vector<2x128xf32>
    %382 = arith.select %380, %378, %381 : vector<2x128xi1>, vector<2x128xf32>
    %cst_159 = arith.constant dense<0.000000e+00> : vector<2xf32>
    %383 = vector.multi_reduction <add>, %382, %cst_159 [1] : vector<2x128xf32> to vector<2xf32>
    %384 = vector.shape_cast %383 : vector<2xf32> to vector<2x1xf32>
    %cst_160 = arith.constant 0.000000e+00 : f32
    %385 = vector.broadcast %cst_160 : f32 to vector<2x1xf32>
    %386 = arith.subf %385, %384 : vector<2x1xf32>
    %cst_161 = arith.constant dense<0.000000e+00> : vector<1xf32>
    %387 = vector.multi_reduction <add>, %386, %cst_161 [0] : vector<2x1xf32> to vector<1xf32>
    %388 = vector.shape_cast %387 : vector<1xf32> to vector<1x1xf32>
    %cst_162 = arith.constant 2.000000e+00 : f32
    %389 = vector.broadcast %cst_162 : f32 to vector<1x1xf32>
    %390 = arith.divf %388, %389 : vector<1x1xf32>
    %c0_163 = arith.constant 0 : index
    %c0_164 = arith.constant 0 : index
    %391 = vector.load %arg26[%c0_163, %c0_164] : memref<32x128xbf16, #tpu.memory_space<vmem>>, vector<32x128xbf16>
    %392 = arith.truncf %344 : vector<16x32xf32> to vector<16x32xbf16>
    %cst_165 = arith.constant dense<0.000000e+00> : vector<16x128xf32>
    %393 = tpu.matmul %392, %391, %cst_165 {dimension_numbers = #tpu.dot_dimension_numbers<[1], [0], [0], [1], [0, 0, 1, 1], [], []>} : vector<16x32xbf16>, vector<32x128xbf16>, vector<16x128xf32> -> vector<16x128xf32>
    %c0_166 = arith.constant 0 : index
    %c0_167 = arith.constant 0 : index
    %394 = vector.load %arg27[%c0_166, %c0_167] : memref<1x128xf32, #tpu.memory_space<vmem>>, vector<1x128xf32>
    %395 = vector.broadcast %394 : vector<1x128xf32> to vector<16x128xf32>
    %396 = arith.addf %393, %395 : vector<16x128xf32>
    %c0_168 = arith.constant 0 : index
    %c0_169 = arith.constant 0 : index
    %397 = vector.load %arg29[%c0_168, %c0_169] : memref<16x128xf32, #tpu.memory_space<vmem>>, vector<16x128xf32>
    tpu.vector_store %arg29[%c0_168, %c0_169], %396 {strides = array<i32>} : memref<16x128xf32, #tpu.memory_space<vmem>>, vector<16x128xf32>,
    %cst_170 = arith.constant 0.000000e+00 : f32
    %398 = vector.broadcast %cst_170 : f32 to vector<1x1xf32>
    %399 = tpu.iota {dimensions = array<i32: 1>} : vector<1x128xi32>
    %c0_i32_171 = arith.constant 0 : i32
    %400 = vector.broadcast %c0_i32_171 : i32 to vector<1x128xi32>
    %401 = arith.cmpi eq, %399, %400 : vector<1x128xi32>
    %cst_172 = arith.constant 0.000000e+00 : f32
    %402 = vector.shape_cast %390 : vector<1x1xf32> to vector<1x1xf32>
    %403 = vector.broadcast %402 : vector<1x1xf32> to vector<1x128xf32>
    %404 = vector.broadcast %cst_172 : f32 to vector<1x128xf32>
    %405 = arith.select %401, %403, %404 : vector<1x128xi1>, vector<1x128xf32>
    %c1_i32 = arith.constant 1 : i32
    %406 = vector.broadcast %c1_i32 : i32 to vector<1x128xi32>
    %407 = arith.cmpi eq, %399, %406 : vector<1x128xi32>
    %cst_173 = arith.constant 0.000000e+00 : f32
    %408 = vector.shape_cast %398 : vector<1x1xf32> to vector<1x1xf32>
    %409 = vector.broadcast %408 : vector<1x1xf32> to vector<1x128xf32>
    %410 = vector.broadcast %cst_173 : f32 to vector<1x128xf32>
    %411 = arith.select %407, %409, %410 : vector<1x128xi1>, vector<1x128xf32>
    %412 = arith.addf %405, %411 : vector<1x128xf32>
    %c0_174 = arith.constant 0 : index
    %c0_175 = arith.constant 0 : index
    %413 = vector.load %arg30[%c0_174, %c0_175] : memref<1x128xf32, #tpu.memory_space<vmem>>, vector<1x128xf32>
    tpu.vector_store %arg30[%c0_174, %c0_175], %412 {strides = array<i32>} : memref<1x128xf32, #tpu.memory_space<vmem>>, vector<1x128xf32>,
    return
  }
}

</mosaic_0001>

<bundles_post_ra>
// kernel: _run_model.1
= control target key start
LH: loop header
LB: loop body
LE: loop exit
PB: predicated region body
PF: predicated region fallthrough
CT: control target
= control target key end

     0   :  { %s3096_s6 = smov 1   ;;  %s3097_s10 = smov 2   ;;  %s3658_s0 = inlined_call_operand.smem [shape: u32[31], index: -1, kind: input, shape index: {}] }
   0x1   :  { %s3147_s5 = sld [smem:[%s3658_s0]]   ;;  %s3098_s14 = smov 3  }
   0x2   :  { %s3152_s9 = sld [smem:[%s3658_s0 + %s3096_s6]]   ;;  %s3099_s18 = smov 5  }
   0x3   :  { %s3157_s13 = sld [smem:[%s3658_s0 + %s3097_s10]]   ;;  %s3100_s22 = smov 6  }
   0x4   :  { %s3162_s17 = sld [smem:[%s3658_s0 + %s3098_s14]]   ;;  %s3101_s26 = smov 7  }
   0x5   :  { %s3167_s21 = sld [smem:[%s3658_s0 + %s3099_s18]]   ;;  %s3102_s30 = smov 8  }
   0x6   :  { %s3172_s25 = sld [smem:[%s3658_s0 + %s3100_s22]]   ;;  %s3103_s4 = smov 9  }
   0x7   :  { %s3177_s29 = sld [smem:[%s3658_s0 + %s3101_s26]]   ;;  %s3104_s10 = smov 10  }
   0x8   :  { %s3182_s3 = sld [smem:[%s3658_s0 + %s3102_s30]]   ;;  %s3105_s15 = smov 11  }
   0x9   :  { %s3187_s8 = sld [smem:[%s3658_s0 + %s3103_s4]]   ;;  %s3106_s20 = smov 12  }
   0xa   :  { %3668 = sst [smem:[#allocation9_spill]] %s3162_s17  ;;  %s3107_s26 = smov 13  }
   0xb   :  { %s3192_s14 = sld [smem:[%s3658_s0 + %s3104_s10]]   ;;  %s3108_s1 = smov 14  }
   0xc   :  { %s3197_s19 = sld [smem:[%s3658_s0 + %s3105_s15]]   ;;  %s3109_s7 = smov 15  }
   0xd   :  { %s3202_s24 = sld [smem:[%s3658_s0 + %s3106_s20]]   ;;  %s3110_s15 = smov 16  }
   0xe   :  { %s3207_s30 = sld [smem:[%s3658_s0 + %s3107_s26]]   ;;  %s3111_s22 = smov 17  }
   0xf   :  { %s3212_s6 = sld [smem:[%s3658_s0 + %s3108_s1]]   ;;  %s3112_s28 = smov 18  }
  0x10   :  { %s3217_s12 = sld [smem:[%s3658_s0 + %s3109_s7]]   ;;  %s3113_s7 = smov 19  }
  0x11   :  { %s3222_s20 = sld [smem:[%s3658_s0 + %s3110_s15]]   ;;  %s3114_s15 = smov 20  }
  0x12   :  { %s3227_s27 = sld [smem:[%s3658_s0 + %s3111_s22]]   ;;  %s3115_s22 = smov 21  }
  0x13   :  { %s3232_s4 = sld [smem:[%s3658_s0 + %s3112_s28]]   ;;  %s3116_s28 = smov 22  }
  0x14   :  { %s3237_s17 = sld [smem:[%s3658_s0 + %s3113_s7]]   ;;  %s3117_s7 = smov 23  }
  0x16   :  { %3669 = sst [smem:[#allocation10_spill]] %s3217_s12 }
  0x17   :  { %s3242_s12 = sld [smem:[%s3658_s0 + %s3114_s15]]   ;;  %s3118_s15 = smov 24  }
  0x18   :  { %3670 = sst [smem:[#allocation11_spill]] %s3227_s27 }
  0x19   :  { %3671 = sst [smem:[#allocation12_spill]] %s3232_s4 }
  0x1a   :  { %3672 = sst [smem:[#allocation13_spill]] %s3237_s17 }
  0x1b   :  { %s3247_s27 = sld [smem:[%s3658_s0 + %s3115_s22]]   ;;  %s3119_s22 = smov 25  }
  0x1c   :  { %s3252_s4 = sld [smem:[%s3658_s0 + %s3116_s28]]   ;;  %s3120_s28 = smov 26  }
  0x1d   :  { %3673 = sst [smem:[#allocation14_spill]] %s3242_s12 }
  0x1e   :  { %s3257_s17 = sld [smem:[%s3658_s0 + %s3117_s7]]   ;;  %s3121_s7 = smov 27  }
  0x1f   :  { %s3262_s12 = sld [smem:[%s3658_s0 + %s3118_s15]]   ;;  %s3122_s15 = smov 28  }
  0x21   :  { %3674 = sst [smem:[#allocation15_spill]] %s3247_s27 }
  0x22   :  { %3675 = sst [smem:[#allocation16_spill]] %s3252_s4 }
  0x23   :  { %s3267_s27 = sld [smem:[%s3658_s0 + %s3119_s22]]   ;;  %s3123_s22 = smov 29  }
  0x24   :  { %3676 = sst [smem:[#allocation17_spill]] %s3257_s17 }
  0x25   :  { %3677 = sst [smem:[#allocation18_spill]] %s3262_s12 }
  0x26   :  { %s3272_s4 = sld [smem:[%s3658_s0 + %s3120_s28]]   ;;  %s3124_s28 = smov 30  }
  0x27   :  { %s3277_s17 = sld [smem:[%s3658_s0 + %s3121_s7]]  }
  0x28   :  { %s3282_s12 = sld [smem:[%s3658_s0 + %s3122_s15]]  }
  0x29   :  { %3678 = sst [smem:[#allocation19_spill]] %s3267_s27 }
  0x2a   :  { %s3287_s27 = sld [smem:[%s3658_s0 + %s3123_s22]]  }
  0x2c   :  { %3679 = sst [smem:[#allocation20_spill]] %s3272_s4 }
  0x2d   :  { %s3292_s4 = sld [smem:[%s3658_s0 + %s3124_s28]]  }
  0x2e   :  { %67 = vsyncpa [#allocation3], 0  ;;  %v126_v0 = vld [vmem:[%s3147_s5] sm:$0xff]  ;;  %v3125_v2 = vmov 0   ;;  %v143_v3 = vld [vmem:[%s3167_s21 + $0x8] sm:$0xff] }
  0x2f   :  { %v142_v1 = vld [vmem:[%s3167_s21] sm:$0xff]  ;;  %2912 = vset.pattern.permute.xlu0 %v3125_v2  ;;  %v144_v4 = vld [vmem:[%s3167_s21 + $0x10] sm:$0xff]  ;;  %v145_v5 = vld [vmem:[%s3167_s21 + $0x18] sm:$0xff]  ;;  %2913 = vset.pattern.permute.xlu1 %v3125_v2 }
  0x30   :  { %131 = vperm.xlu0 %2912, %v126_v0   ;;  %v2837_v6 = vpack.c.bf16 %v143_v3, %v142_v1  ;;  %v2841_v7 = vpack.c.bf16 %v145_v5, %v144_v4  ;;  %v127_v8 = vld [vmem:[%s3147_s5 + $0x8] sm:$0xff]  ;;  %v146_v9 = vld [vmem:[%s3167_s21 + $0x20] sm:$0xff]  ;;  %v148_v11 = vld [vmem:[%s3167_s21 + $0x30] sm:$0xff] }
  0x31   :  { %v147_v10 = vld [vmem:[%s3167_s21 + $0x28] sm:$0xff]  ;;  %v149_v13 = vld [vmem:[%s3167_s21 + $0x38] sm:$0xff]  ;;  %v159_v14 = vld [vmem:[%s3152_s9] sm:$0xff] }
  0x32   :  { %2838 = vmatprep.subr.bf16.mxu0 %v2837_v6  ;;  %v2845_v12 = vpack.c.bf16 %v147_v10, %v146_v9  ;;  %v160_v15 = vld [vmem:[%s3152_s9 + $0x8] sm:$0xff]  ;;  %vm161_vm0 = vcmp.eq.s32.totalorder %v159_v14, 0  ;;  %v150_v16 = vld [vmem:[%s3167_s21 + $0x40] sm:$0xff]  ;;  %v2849_v20 = vpack.c.bf16 %v149_v13, %v148_v11  ;;  %v152_v21 = vld [vmem:[%s3167_s21 + $0x50] sm:$0xff] }
  0x33   :  { %2840 = vmatpush3.bf16.msra.mxu0 %v2837_v6  ;;  %vm162_vm1 = vcmp.eq.s32.totalorder %v160_v15, 0  ;;  %v151_v17 = vld [vmem:[%s3167_s21 + $0x48] sm:$0xff]  ;;  %v165_v18 = vsel %vm161_vm0, 1, %v3125_v2  ;;  %v153_v22 = vld [vmem:[%s3167_s21 + $0x58] sm:$0xff]  ;;  %v154_v24 = vld [vmem:[%s3167_s21 + $0x60] sm:$0xff] }
  0x34   :  { %134 = vperm.xlu0 %2912, %v127_v8   ;;  %2842 = vmatprep.subr.bf16.mxu0 %v2841_v7  ;;  %v166_v19 = vsel %vm162_vm1, 1, %v3125_v2  ;;  %v2853_v23 = vpack.c.bf16 %v151_v17, %v150_v16  ;;  %v155_v25 = vld [vmem:[%s3167_s21 + $0x68] sm:$0xff]  ;;  %v2857_v26 = vpack.c.bf16 %v153_v22, %v152_v21  ;;  %v156_v27 = vld [vmem:[%s3167_s21 + $0x70] sm:$0xff]  ;;  %v157_v28 = vld [vmem:[%s3167_s21 + $0x78] sm:$0xff] }
  0x35   :  { %168 = vperm.xlu1 %2913, %v165_v18   ;;  %v2861_v29 = vpack.c.bf16 %v155_v25, %v154_v24 }
  0x37   :  { %2844 = vmatpush3.bf16.msra.mxu0 %v2841_v7 }
  0x38   :  { %2846 = vmatprep.subr.bf16.mxu0 %v2845_v12 }
  0x39   :  { %171 = vperm.xlu1 %2913, %v166_v19  }
  0x3b   :  { %2848 = vmatpush3.bf16.msra.mxu0 %v2845_v12 }
  0x3c   :  { %2850 = vmatprep.subr.bf16.mxu0 %v2849_v20 }
  0x3f   :  { %2852 = vmatpush3.bf16.msra.mxu0 %v2849_v20 }
  0x40   :  { %2854 = vmatprep.subr.bf16.mxu0 %v2853_v23 }
  0x43   :  { %2856 = vmatpush3.bf16.msra.mxu0 %v2853_v23 }
  0x44   :  { %2858 = vmatprep.subr.bf16.mxu0 %v2857_v26 }
  0x47   :  { %2860 = vmatpush3.bf16.msra.mxu0 %v2857_v26 }
  0x48   :  { %68 = vsyncpa [#allocation5], 0  ;;  %2862 = vmatprep.subr.bf16.mxu0 %v2861_v29  ;;  %v2865_v30 = vpack.c.bf16 %v157_v28, %v156_v27  ;;  %v128_v31 = vlaneseq  ;;  %v3126_v34 = vmov 1.0   ;;  %v2416_v38 = vld [vmem:[%s3177_s29] ss:$0 sm:$0xff]  ;;  %vm264_vm6 = vcmask 261120  }
  0x49   :  { %v2417_v39 = vld [vmem:[%s3177_s29 + $0x1] ss:$0 sm:$0xff]  ;;  %v3127_v62 = vmov 0.0   ;;  %v2935_v63 = vld [vmem:[%s3192_s14 + $0x8] sm:$0xff]   ;;  %vm3128_vm7 = vmmov 0   ;;  %s3129_s0 = smov 96  }
  0x4a   :  { %v3315_v32 = vand.u32 127, %v128_v31  ;;  %v158_v40 = vld [vmem:[%s3172_s25] sm:$0xff]  ;;  %2645 = vmatprep.subr.bf16.mxu1 %v3127_v62  ;;  %2649 = vmatprep.mubr.msk.bf16.mxu1 %vm3128_vm7, %v3127_v62  ;;  %s3130_s5 = smov 112   ;;  %vm427_vm8 = vcmask 130048   ;;  %vm629_vm9 = vcmask 64512   ;;  %s3132_s9 = smov 64  }
  0x4b   :  { %2864 = vmatpush3.bf16.msra.mxu0 %v2861_v29  ;;  %v2934_v61 = vld [vmem:[%s3192_s14] sm:$0xff]   ;;  %vm683_vm10 = vcmask 1043456   ;;  %s3680_s21 = sld [smem:[#allocation10_spill]]  ;;  %s3681_s25 = sld [smem:[#allocation12_spill]]  ;;  %vm1121_vm11 = vcmask 523264   ;;  %vm2106_vm12 = vcmask 1041409  }
  0x4c   :  { %2866 = vmatprep.subr.bf16.mxu0 %v2865_v30  ;;  %2646 = vmatpush3.bf16.msra.mxu1 %v2934_v61  ;;  %v2420_v8 = vld [vmem:[%s3182_s3] ss:$0 sm:$0xff]  ;;  %s3682_s29 = sld [smem:[#allocation11_spill]]  ;;  %s3683_s3 = sld [smem:[#allocation13_spill]]  ;;  %vm2234_vm13 = vcmp.lt.s32.totalorder %v3315_v32, 3  ;;  %vm2236_vm14 = vcmask 1041408  }
  0x4d   :  { %2647 = vmatprep.subr.bf16.mxu1 %v3127_v62  ;;  %v2421_v12 = vld [vmem:[%s3187_s8] ss:$0 sm:$0xff]  ;;  %s3684_s8 = sld [smem:[#allocation14_spill]]  ;;  %s3685_s7 = sld [smem:[#allocation15_spill]] }
  0x4e   :  { %v2423_v17 = vld [vmem:[%s3197_s19] ss:$0 sm:$0xff] }
  0x4f   :  { %2868 = vmatpush3.bf16.msra.mxu0 %v2865_v30 }
  0x50   :  { %2671 = vmatprep.subr.bf16.mxu0 %v3127_v62  ;;  %2648 = vmatpush3.bf16.msra.mxu1 %v2935_v63 }
  0x51   :  { %2653 = vmatprep.subr.bf16.mxu1 %v3127_v62 }
  0xaf   :  { %v132_v33 = vpop.permute.xlu0 %131 }
  0xb0   :  { %vm136_vm2 = vcmp.eq.s32.totalorder %v3315_v32, %v132_v33 }
  0xb1   :  { %2642 = vmatprep.mubr.msk.f32.mxu0 %vm136_vm2, %v3126_v34 }
  0xb3   :  { %v135_v35 = vpop.permute.xlu0 %134 }
  0xb4   :  { %vm137_vm3 = vcmp.eq.s32.totalorder %v3315_v32, %v135_v35  ;;  %v169_v36 = vpop.permute.xlu1 %168 }
  0xb5   :  { %2643 = vmatmul.mubr.msk.f32.vlgmr.msra.gmra.mrb[0].mxu0 %vm137_vm3, %v3126_v34  ;;  %vm173_vm5 = vcmp.eq.s32.totalorder %v169_v36, 1 }
  0xb6   :  { %v183_v43 = vsel %vm173_vm5, %v2416_v38, %v2417_v39  ;;  %2673 = vmatprep.mubr.msk.bf16.mxu0 %vm3128_vm7, %v3127_v62 }
  0xb8   :  { %v172_v37 = vpop.permute.xlu1 %171 }
  0xb9   :  { %vm174_vm4 = vcmp.eq.s32.totalorder %v172_v37, 1 }
  0xba   :  { %v184_v41 = vsel %vm174_vm4, %v2416_v38, %v2417_v39 }
 0x188   :  { %v2644_v42 = vpop.f32.mrb[0].mxu0 }
 0x189   :  { %v257_v44 = vadd.f32 %v2644_v42, %v158_v40  ;;  %v251_v45 = vpop.f32.mrb[1].mxu0  ;;  %v3131_v42 = vmov 1966171168  }
 0x18a   :  { %v252_v46 = vadd.f32 %v251_v45, %v158_v40 }
 0x18b   :  { %v261_v47 = vadd.f32 %v257_v44, %v184_v41  ;;  %v308_v44 = vld [vmem:[%s3157_s13] sm:$0x3]  ;;  %s3133_s13 = smov 16  }
 0x18c   :  { %v260_v48 = vadd.f32 %v252_v46, %v183_v43  ;;  %v313_v43 = vunpack.c.l.s4 %v3131_v42  ;;  %v2422_v45 = vadd.f32 -1.0, %v308_v44 }
 0x18d   :  { %v268_v49 = vsel %vm264_vm6, %v261_v47, 0.0 }
 0x18e   :  { %269 = vadd.xlane.f32.xlu1 %v268_v49  ;;  %v265_v50 = vsel %vm264_vm6, %v260_v48, 0.0  ;;  %v314_v46 = vunpack.c.0.s8 %v313_v43 }
 0x18f   :  { %266 = vadd.xlane.f32.xlu0 %v265_v50 }
 0x21b   :  { %v270_v51 = vpop.xlane.xlu1 %269 }
 0x21c   :  { %v273_v52 = vmul.f32 0.03125, %v270_v51  ;;  %v267_v53 = vpop.xlane.xlu0 %266 }
 0x21d   :  { %v272_v54 = vmul.f32 0.03125, %v267_v53 }
 0x21e   :  { %v275_v55 = vsub.f32 %v261_v47, %v273_v52  ;;  %v316_v47 = vshrl.u32 %v128_v31, 7 }
 0x21f   :  { %v274_v56 = vsub.f32 %v260_v48, %v272_v54  ;;  %v310_v48 = vmul.f32 10000.0, %v2422_v45 }
 0x220   :  { %v277_v59 = vmul.f32 %v275_v55, %v275_v55  ;;  %v317_v49 = vsub.s32 %v314_v46, %v316_v47  ;;  %v336_v52 = vsub.s32 0, %v316_v47 }
 0x221   :  { %v276_v57 = vmul.f32 %v274_v56, %v274_v56 }
 0x222   :  { %v281_v60 = vsel %vm264_vm6, %v277_v59, 0.0  ;;  %v318_v50 = vrot.slane %v310_v48, %v317_v49 }
 0x223   :  { %v278_v58 = vsel %vm264_vm6, %v276_v57, 0.0 }
 0x224   :  { %279 = vadd.xlane.f32.xlu0 %v278_v58  ;;  %v326_v51 = vrot.slane %v318_v50, %v317_v49  ;;  %v319_v54 = vcombine.high %v318_v50, %v318_v50 }
 0x226   :  { %v3391_v53 = vrot.slane %v326_v51, %v336_v52  ;;  %v333_v61 = vrot.slane %v319_v54, %v317_v49 }
 0x228   :  { %282 = vadd.xlane.f32.xlu0 %v281_v60  ;;  %v3395_v31 = vrot.slane %v333_v61, %v336_v52 }
 0x2b1   :  { %v280_v0 = vpop.xlane.xlu0 %279 }
 0x2b2   :  { %v284_v1 = vmul.f32 0.03125, %v280_v0 }
 0x2b4   :  { %v286_v2 = vadd.f32 1e-12, %v284_v1 }
 0x2b5   :  { %v283_v3 = vpop.xlane.xlu0 %282 }
 0x2b6   :  { %2960 = vrsqrt.f32 %v286_v2  ;;  %v285_v4 = vmul.f32 0.03125, %v283_v3 }
 0x2b8   :  { %v287_v5 = vadd.f32 1e-12, %v285_v4 }
 0x2ba   :  { %2962 = vrsqrt.f32 %v287_v5 }
 0x2c0   :  { %v2961_v6 = vpop.eup %2960 }
 0x2c1   :  { %v290_v7 = vmul.f32 %v2961_v6, %v274_v56 }
 0x2c3   :  { %v298_v11 = vmul.f32 %v2420_v8, %v290_v7 }
 0x2c4   :  { %v2963_v9 = vpop.eup %2962 }
 0x2c5   :  { %v291_v10 = vmul.f32 %v2963_v9, %v275_v55  ;;  %v3338_v14 = vadd.f32 %v2421_v12, %v298_v11 }
 0x2c7   :  { %v299_v13 = vmul.f32 %v2420_v8, %v291_v10 }
 0x2c9   :  { %v3340_v15 = vadd.f32 %v2421_v12, %v299_v13 }
 0x2cb   :  { %v348_v16 = vpack.c.bf16 %v3340_v15, %v3338_v14 }
 0x2cd   :  { %2650 = vmatmul.mubr.msk.bf16.vlgmr.msra.gmra.mrb[0].mxu1 %vm264_vm6, %v348_v16 }
 0x2ce   :  { %2655 = vmatprep.mubr.msk.bf16.mxu1 %vm3128_vm7, %v3127_v62 }
 0x3a0   :  { %v405_v18 = vpop.f32.mrb[0].mxu1 }
 0x3a1   :  { %v406_v19 = vadd.f32 %v2423_v17, %v405_v18  ;;  %v2651_v20 = vpop.f32.mrb[1].mxu1 }
 0x3a2   :  { %v408_v21 = vpop.f32.mrb[2].mxu1 }
 0x3a3   :  { %v3348_v22 = vpack.c.bf16 %v406_v19, %v406_v19  ;;  %v409_v23 = vadd.f32 %v2423_v17, %v408_v21  ;;  %v2652_v24 = vpop.f32.mrb[3].mxu1 }
 0x3a5   :  { %v2914_v25 = vpack.i.bf16 %v409_v23, %v406_v19  ;;  %425 = vrot.lane.b32.xlu0 %v3348_v22, %s3129_s0  ;;  %v3353_v26 = vpack.c.bf16 %v409_v23, %v409_v23 }
 0x3a7   :  { %2915 = vrot.lane.b32.xlu1 %v2914_v25, %s3130_s5 }
 0x3ab   :  { %475 = vrot.lane.b32.xlu1 %v3353_v26, %s3129_s0 }
 0x417   :  { %v426_v27 = vpop.permute.xlu0 %425 }
 0x418   :  { %v432_v28 = vsel %vm427_vm8, %v426_v27, 0 }
 0x419   :  { %2654 = vmatpush3.bf16.xpose.msra.mxu1 %v432_v28  ;;  %v2916_v29 = vpop.permute.xlu1 %2915 }
 0x41a   :  { %v2918_v30 = vunpack.i.h.bf16 %v2916_v29  ;;  %v2917_v33 = vunpack.i.l.bf16 %v2916_v29  ;;  %2659 = vmatprep.subr.bf16.mxu1 %v3127_v62 }
 0x41c   :  { %v3359_v34 = vpack.c.bf16 %v2918_v30, %v2918_v30  ;;  %v3361_v35 = vpack.c.bf16 %v2917_v33, %v2917_v33 }
 0x41d   :  { %v476_v36 = vpop.permute.xlu1 %475 }
 0x41e   :  { %573 = vrot.lane.b32.xlu0 %v3359_v34, %s3129_s0  ;;  %524 = vrot.lane.b32.xlu1 %v3361_v35, %s3129_s0  ;;  %v481_v37 = vsel %vm427_vm8, %v476_v36, 0 }
 0x420   :  { %2656 = vmatmul.mubr.msk.bf16.vlgmr.msra.gmra.mrb[4].mxu1 %vm427_vm8, %v3348_v22 }
 0x421   :  { %2660 = vmatpush3.bf16.xpose.msra.mxu1 %v481_v37  ;;  %2661 = vmatprep.mubr.msk.bf16.mxu1 %vm3128_vm7, %v3127_v62 }
 0x422   :  { %2665 = vmatprep.subr.bf16.mxu1 %v3127_v62 }
 0x428   :  { %2662 = vmatmul.mubr.msk.bf16.vlgmr.msra.gmra.mrb[8].mxu1 %vm427_vm8, %v3353_v26 }
 0x429   :  { %2667 = vmatprep.mubr.msk.bf16.mxu1 %vm3128_vm7, %v3127_v62 }
 0x490   :  { %v574_v38 = vpop.permute.xlu0 %573  ;;  %v525_v39 = vpop.permute.xlu1 %524 }
 0x491   :  { %v579_v40 = vsel %vm427_vm8, %v574_v38, 0  ;;  %v530_v41 = vsel %vm427_vm8, %v525_v39, 0 }
 0x492   :  { %2666 = vmatpush3.bf16.xpose.msra.mxu1 %v530_v41  ;;  %2672 = vmatpush3.bf16.xpose.msra.mxu0 %v579_v40 }
 0x493   :  { %2677 = vmatprep.subr.bf16.mxu1 %v3127_v62  ;;  %2683 = vmatprep.subr.bf16.mxu0 %v3127_v62 }
 0x499   :  { %2668 = vmatmul.mubr.msk.bf16.vlgmr.msra.gmra.mrb[12].mxu1 %vm427_vm8, %v3361_v35  ;;  %2674 = vmatmul.mubr.msk.bf16.vlgmr.msra.gmra.mrb[4].mxu0 %vm427_vm8, %v3359_v34 }
 0x49a   :  { %2679 = vmatprep.mubr.msk.bf16.mxu1 %vm3128_vm7, %v3127_v62  ;;  %2685 = vmatprep.mubr.msk.bf16.mxu0 %vm3128_vm7, %v3127_v62 }
 0x4f3   :  { %v468_v55 = vpop.f32.mrb[4].mxu1 }
 0x4f4   :  { %v621_v56 = vmul.f32 0.25, %v468_v55  ;;  %v2657_v57 = vpop.f32.mrb[5].mxu1 }
 0x4f5   :  { %v471_v58 = vpop.f32.mrb[6].mxu1 }
 0x4f6   :  { %v2658_v59 = vpop.f32.mrb[7].mxu1  ;;  %v625_v60 = vadd.f32 %v621_v56, %v3391_v53 }
 0x4f8   :  { %v630_v63 = vsel %vm629_vm9, %v625_v60, -inf }
 0x4f9   :  { %631 = vmax.xlane.f32.xlu1 %v630_v63 }
 0x4fb   :  { %v517_v0 = vpop.f32.mrb[8].mxu1 }
 0x4fc   :  { %v622_v1 = vmul.f32 0.25, %v517_v0  ;;  %v2663_v2 = vpop.f32.mrb[9].mxu1 }
 0x4fd   :  { %v520_v3 = vpop.f32.mrb[10].mxu1 }
 0x4fe   :  { %v2664_v4 = vpop.f32.mrb[11].mxu1  ;;  %v626_v5 = vadd.f32 %v622_v1, %v3395_v31 }
 0x500   :  { %v633_v6 = vsel %vm629_vm9, %v626_v5, -inf }
 0x501   :  { %634 = vmax.xlane.f32.xlu0 %v633_v6 }
 0x56c   :  { %v566_v7 = vpop.f32.mrb[12].mxu1  ;;  %v615_v8 = vpop.f32.mrb[4].mxu0 }
 0x56d   :  { %v623_v9 = vmul.f32 0.25, %v566_v7  ;;  %v624_v10 = vmul.f32 0.25, %v615_v8  ;;  %v2669_v11 = vpop.f32.mrb[13].mxu1  ;;  %v2675_v12 = vpop.f32.mrb[5].mxu0  ;;  %v2936_v7 = vld [vmem:[%s3202_s24] sm:$0xff]  }
 0x56e   :  { %v569_v13 = vpop.f32.mrb[14].mxu1  ;;  %v618_v16 = vpop.f32.mrb[6].mxu0 }
 0x56f   :  { %v2670_v17 = vpop.f32.mrb[15].mxu1  ;;  %v2676_v18 = vpop.f32.mrb[7].mxu0  ;;  %v628_v19 = vadd.f32 %v624_v10, %v3395_v31  ;;  %v627_v20 = vadd.f32 %v623_v9, %v3391_v53 }
 0x570   :  { %v2937_v18 = vld [vmem:[%s3202_s24 + $0x8] sm:$0xff]  }
 0x571   :  { %v639_v21 = vsel %vm629_vm9, %v628_v19, -inf  ;;  %v636_v23 = vsel %vm629_vm9, %v627_v20, -inf }
 0x572   :  { %640 = vmax.xlane.f32.xlu1 %v639_v21  ;;  %637 = vmax.xlane.f32.xlu0 %v636_v23 }
 0x583   :  { %727 = vrot.lane.b32.xlu1 %v3353_v26, %s3132_s9 }
 0x586   :  { %v632_v24 = vpop.xlane.xlu1 %631 }
 0x587   :  { %v642_v27 = vsub.f32 %v625_v60, %v632_v24 }
 0x588   :  { %678 = vrot.lane.b32.xlu0 %v3348_v22, %s3132_s9 }
 0x589   :  { %v646_v29 = vmul.f32 1.442695, %v642_v27 }
 0x58b   :  { %2964 = vpow2.f32 %v646_v29 }
 0x58e   :  { %v635_v25 = vpop.xlane.xlu0 %634 }
 0x58f   :  { %v643_v28 = vsub.f32 %v626_v5, %v635_v25 }
 0x591   :  { %v648_v30 = vmul.f32 1.442695, %v643_v28 }
 0x593   :  { %2966 = vpow2.f32 %v648_v30 }
 0x595   :  { %v2965_v33 = vpop.eup %2964 }
 0x596   :  { %v654_v38 = vsel %vm629_vm9, %v2965_v33, 0.0 }
 0x59d   :  { %v2967_v36 = vpop.eup %2966 }
 0x59e   :  { %v657_v37 = vsel %vm629_vm9, %v2967_v36, 0.0 }
 0x5a7   :  { %658 = vadd.xlane.f32.xlu1 %v657_v37  ;;  %655 = vadd.xlane.f32.xlu0 %v654_v38 }
 0x5ff   :  { %v641_v26 = vpop.xlane.xlu1 %640  ;;  %v638_v39 = vpop.xlane.xlu0 %637 }
 0x600   :  { %v645_v40 = vsub.f32 %v628_v19, %v641_v26  ;;  %v644_v22 = vsub.f32 %v627_v20, %v638_v39  ;;  %v2435_v39 = vld [vmem:[%s3207_s30] ss:$0 sm:$0xff] }
 0x602   :  { %v652_v41 = vmul.f32 1.442695, %v645_v40  ;;  %v650_v42 = vmul.f32 1.442695, %v644_v22 }
 0x603   :  { %v728_v43 = vpop.permute.xlu1 %727  ;;  %v679_v44 = vpop.permute.xlu0 %678 }
 0x604   :  { %2968 = vpow2.f32 %v652_v41  ;;  %v733_v45 = vsel %vm683_vm10, %v728_v43, 0  ;;  %v685_v46 = vsel %vm683_vm10, %v679_v44, 0 }
 0x605   :  { %2970 = vpow2.f32 %v650_v42  ;;  %2678 = vmatpush3.bf16.msra.mxu1 %v685_v46  ;;  %2684 = vmatpush3.bf16.msra.mxu0 %v733_v45 }
 0x606   :  { %2689 = vmatprep.subr.bf16.mxu1 %v3127_v62  ;;  %2695 = vmatprep.subr.bf16.mxu0 %v3127_v62 }
 0x60e   :  { %v2969_v47 = vpop.eup %2968 }
 0x60f   :  { %v2971_v48 = vpop.eup %2970  ;;  %v663_v49 = vsel %vm629_vm9, %v2969_v47, 0.0 }
 0x610   :  { %664 = vadd.xlane.f32.xlu1 %v663_v49  ;;  %v660_v50 = vsel %vm629_vm9, %v2971_v48, 0.0 }
 0x611   :  { %661 = vadd.xlane.f32.xlu0 %v660_v50 }
 0x621   :  { %775 = vrot.lane.b32.xlu1 %v3361_v35, %s3132_s9 }
 0x627   :  { %823 = vrot.lane.b32.xlu0 %v3359_v34, %s3132_s9 }
 0x634   :  { %v659_v51 = vpop.xlane.xlu1 %658  ;;  %v656_v52 = vpop.xlane.xlu0 %655 }
 0x635   :  { %2972 = vrcp.f32 %v659_v51 }
 0x636   :  { %2974 = vrcp.f32 %v656_v52 }
 0x63f   :  { %v2973_v54 = vpop.eup %2972 }
 0x640   :  { %v2975_v55 = vpop.eup %2974  ;;  %v671_v56 = vmul.f32 %v2973_v54, %v2967_v36 }
 0x641   :  { %v670_v57 = vmul.f32 %v2975_v55, %v2965_v33 }
 0x642   :  { %v675_v58 = vpack.c.bf16 %v671_v56, %v671_v56 }
 0x643   :  { %v674_v59 = vpack.c.bf16 %v670_v57, %v670_v57 }
 0x644   :  { %2686 = vmatmul.mubr.msk.bf16.vlgmr.msra.gmra.mrb[8].mxu0 %vm629_vm9, %v675_v58 }
 0x645   :  { %2680 = vmatmul.mubr.msk.bf16.vlgmr.msra.gmra.mrb[16].mxu1 %vm629_vm9, %v674_v59  ;;  %2697 = vmatprep.mubr.msk.bf16.mxu0 %vm3128_vm7, %v3127_v62  ;;  %v2939_v59 = vld [vmem:[%s3222_s20 + $0x8] sm:$0xff]  }
 0x646   :  { %2691 = vmatprep.mubr.msk.bf16.mxu1 %vm3128_vm7, %v3127_v62 }
 0x69d   :  { %v665_v34 = vpop.xlane.xlu1 %664 }
 0x69e   :  { %2976 = vrcp.f32 %v665_v34  ;;  %v662_v35 = vpop.xlane.xlu0 %661 }
 0x69f   :  { %2978 = vrcp.f32 %v662_v35 }
 0x6a1   :  { %v776_v60 = vpop.permute.xlu1 %775 }
 0x6a2   :  { %v781_v61 = vsel %vm683_vm10, %v776_v60, 0  ;;  %v824_v63 = vpop.permute.xlu0 %823 }
 0x6a3   :  { %v829_v0 = vsel %vm683_vm10, %v824_v63, 0  ;;  %2690 = vmatpush3.bf16.msra.mxu1 %v781_v61 }
 0x6a4   :  { %2696 = vmatpush3.bf16.msra.mxu0 %v829_v0  ;;  %2701 = vmatprep.subr.bf16.mxu1 %v3127_v62 }
 0x6a5   :  { %2709 = vmatprep.subr.bf16.mxu0 %v3127_v62 }
 0x6a8   :  { %v2977_v1 = vpop.eup %2976 }
 0x6a9   :  { %v2979_v2 = vpop.eup %2978  ;;  %v673_v3 = vmul.f32 %v2977_v1, %v2969_v47 }
 0x6aa   :  { %v672_v4 = vmul.f32 %v2979_v2, %v2971_v48 }
 0x6ab   :  { %v677_v5 = vpack.c.bf16 %v673_v3, %v673_v3  ;;  %v2439_v3 = vld [vmem:[%s3212_s6] ss:$0 sm:$0xff] }
 0x6ac   :  { %v676_v6 = vpack.c.bf16 %v672_v4, %v672_v4 }
 0x6ad   :  { %2698 = vmatmul.mubr.msk.bf16.vlgmr.msra.gmra.mrb[12].mxu0 %vm629_vm9, %v677_v5 }
 0x6ae   :  { %2692 = vmatmul.mubr.msk.bf16.vlgmr.msra.gmra.mrb[20].mxu1 %vm629_vm9, %v676_v6  ;;  %2713 = vmatprep.mubr.msk.bf16.mxu0 %vm3128_vm7, %v3127_v62 }
 0x6af   :  { %2705 = vmatprep.mubr.msk.bf16.mxu1 %vm3128_vm7, %v3127_v62  ;;  %2702 = vmatpush3.bf16.msra.mxu1 %v2936_v7  ;;  %v2440_v7 = vld [vmem:[%s3680_s21] ss:$0 sm:$0xff] }
 0x6b0   :  { %2703 = vmatprep.subr.bf16.mxu1 %v3127_v62 }
 0x6b3   :  { %2704 = vmatpush3.bf16.msra.mxu1 %v2937_v18  ;;  %v2441_v18 = vld [vmem:[%s3682_s29] ss:$0 sm:$0xff] }
 0x6b4   :  { %2717 = vmatprep.subr.bf16.mxu1 %v3127_v62 }
 0x717   :  { %v769_v8 = vpop.f32.mrb[8].mxu0 }
 0x718   :  { %v721_v9 = vpop.f32.mrb[16].mxu1  ;;  %v2687_v10 = vpop.f32.mrb[9].mxu0 }
 0x719   :  { %v2681_v11 = vpop.f32.mrb[17].mxu1  ;;  %v772_v12 = vpop.f32.mrb[10].mxu0 }
 0x71a   :  { %v724_v13 = vpop.f32.mrb[18].mxu1  ;;  %v2688_v16 = vpop.f32.mrb[11].mxu0  ;;  %v2940_v12 = vld [vmem:[%s3681_s25] sm:$0xff]  }
 0x71b   :  { %v2682_v17 = vpop.f32.mrb[19].mxu1  ;;  %v2941_v13 = vld [vmem:[%s3681_s25 + $0x8] sm:$0xff]   ;;  %v2942_v16 = vld [vmem:[%s3681_s25 + $0x10] sm:$0xff]  }
 0x71c   :  { %v2943_v17 = vld [vmem:[%s3681_s25 + $0x18] sm:$0xff]  }
 0x780   :  { %v865_v19 = vpop.f32.mrb[12].mxu0 }
 0x781   :  { %v817_v20 = vpop.f32.mrb[20].mxu1  ;;  %v2699_v21 = vpop.f32.mrb[13].mxu0 }
 0x782   :  { %v2919_v23 = vpack.i.bf16 %v865_v19, %v817_v20  ;;  %v2693_v24 = vpop.f32.mrb[21].mxu1  ;;  %v868_v25 = vpop.f32.mrb[14].mxu0 }
 0x783   :  { %v820_v27 = vpop.f32.mrb[22].mxu1  ;;  %v2700_v28 = vpop.f32.mrb[15].mxu0 }
 0x784   :  { %2920 = vrot.lane.b32.xlu1 %v2919_v23, %s3133_s13  ;;  %v2694_v29 = vpop.f32.mrb[23].mxu1 }
 0x7f6   :  { %v2921_v30 = vpop.permute.xlu1 %2920 }
 0x7f7   :  { %v2923_v33 = vunpack.i.h.bf16 %v2921_v30  ;;  %v2922_v36 = vunpack.i.l.bf16 %v2921_v30 }
 0x7f9   :  { %v880_v37 = vsel %vm427_vm8, %v769_v8, %v2923_v33  ;;  %v879_v38 = vsel %vm427_vm8, %v721_v9, %v2922_v36 }
 0x7fa   :  { %v885_v26 = vpack.c.bf16 %v880_v37, %v879_v38 }
 0x7fc   :  { %2706 = vmatmul.mubr.msk.bf16.vlgmr.msra.gmra.mrb[24].mxu1 %vm264_vm6, %v885_v26 }
 0x7fd   :  { %2725 = vmatprep.mubr.msk.bf16.mxu1 %vm3128_vm7, %v3127_v62  ;;  %2718 = vmatpush3.bf16.msra.mxu1 %v2940_v12  ;;  %v2451_v12 = vld [vmem:[%s3684_s8] ss:$0 sm:$0xff] }
 0x7fe   :  { %2719 = vmatprep.subr.bf16.mxu1 %v3127_v62 }
 0x801   :  { %2720 = vmatpush3.bf16.msra.mxu1 %v2941_v13 }
 0x802   :  { %2721 = vmatprep.subr.bf16.mxu1 %v3127_v62 }
 0x805   :  { %2722 = vmatpush3.bf16.msra.mxu1 %v2942_v16 }
 0x806   :  { %2723 = vmatprep.subr.bf16.mxu1 %v3127_v62 }
 0x809   :  { %2724 = vmatpush3.bf16.msra.mxu1 %v2943_v17 }
 0x80a   :  { %2743 = vmatprep.subr.bf16.mxu1 %v3127_v62 }
 0x8cf   :  { %v942_v40 = vpop.f32.mrb[24].mxu1 }
 0x8d0   :  { %v943_v22 = vadd.f32 %v2435_v39, %v942_v40  ;;  %v2707_v41 = vpop.f32.mrb[25].mxu1 }
 0x8d1   :  { %v945_v42 = vpop.f32.mrb[26].mxu1 }
 0x8d2   :  { %v946_v43 = vadd.f32 %v2435_v39, %v945_v42  ;;  %v2708_v44 = vpop.f32.mrb[27].mxu1  ;;  %v949_v45 = vadd.f32 %v943_v22, %v3338_v14 }
 0x8d4   :  { %v953_v46 = vsel %vm264_vm6, %v949_v45, 0.0  ;;  %v950_v47 = vadd.f32 %v946_v43, %v3340_v15  ;;  %v2938_v15 = vld [vmem:[%s3222_s20] sm:$0xff]  }
 0x8d5   :  { %954 = vadd.xlane.f32.xlu0 %v953_v46  ;;  %2710 = vmatpush3.bf16.msra.mxu0 %v2938_v15 }
 0x8d6   :  { %v956_v48 = vsel %vm264_vm6, %v950_v47, 0.0  ;;  %2711 = vmatprep.subr.bf16.mxu0 %v3127_v62 }
 0x8d7   :  { %957 = vadd.xlane.f32.xlu1 %v956_v48  ;;  %v2445_v48 = vld [vmem:[%s3683_s3] ss:$0 sm:$0xff] }
 0x8d9   :  { %2712 = vmatpush3.bf16.msra.mxu0 %v2939_v59 }
 0x8da   :  { %2729 = vmatprep.subr.bf16.mxu0 %v3127_v62 }
 0x962   :  { %v955_v49 = vpop.xlane.xlu0 %954 }
 0x963   :  { %v959_v50 = vmul.f32 0.03125, %v955_v49 }
 0x964   :  { %v958_v51 = vpop.xlane.xlu1 %957 }
 0x965   :  { %v961_v52 = vsub.f32 %v949_v45, %v959_v50  ;;  %v960_v54 = vmul.f32 0.03125, %v958_v51 }
 0x967   :  { %v962_v55 = vsub.f32 %v950_v47, %v960_v54  ;;  %v963_v56 = vmul.f32 %v961_v52, %v961_v52 }
 0x969   :  { %v965_v57 = vsel %vm264_vm6, %v963_v56, 0.0  ;;  %v964_v14 = vmul.f32 %v962_v55, %v962_v55 }
 0x96a   :  { %966 = vadd.xlane.f32.xlu0 %v965_v57 }
 0x96b   :  { %v968_v58 = vsel %vm264_vm6, %v964_v14, 0.0 }
 0x96e   :  { %969 = vadd.xlane.f32.xlu0 %v968_v58 }
 0x9f7   :  { %v967_v34 = vpop.xlane.xlu0 %966 }
 0x9f8   :  { %v971_v35 = vmul.f32 0.03125, %v967_v34 }
 0x9fa   :  { %v973_v60 = vadd.f32 1e-12, %v971_v35 }
 0x9fb   :  { %v970_v61 = vpop.xlane.xlu0 %969 }
 0x9fc   :  { %2980 = vrsqrt.f32 %v973_v60  ;;  %v972_v63 = vmul.f32 0.03125, %v970_v61 }
 0x9fe   :  { %v974_v0 = vadd.f32 1e-12, %v972_v63 }
 0xa00   :  { %2982 = vrsqrt.f32 %v974_v0 }
 0xa06   :  { %v2981_v1 = vpop.eup %2980 }
 0xa07   :  { %v977_v2 = vmul.f32 %v2981_v1, %v961_v52 }
 0xa09   :  { %v985_v5 = vmul.f32 %v2439_v3, %v977_v2 }
 0xa0a   :  { %v2983_v4 = vpop.eup %2982 }
 0xa0b   :  { %v978_v6 = vmul.f32 %v2983_v4, %v962_v55  ;;  %v993_v9 = vadd.f32 %v2440_v7, %v985_v5  ;;  %v2945_v4 = vld [vmem:[%s3192_s14 + $0x18] sm:$0xff]  }
 0xa0d   :  { %v986_v8 = vmul.f32 %v2439_v3, %v978_v6  ;;  %v2944_v3 = vld [vmem:[%s3192_s14 + $0x10] sm:$0xff]   ;;  %s3686_s14 = sld [smem:[#allocation20_spill]] }
 0xa0f   :  { %v994_v10 = vadd.f32 %v2440_v7, %v986_v8 }
 0xa11   :  { %v999_v11 = vpack.c.bf16 %v994_v10, %v993_v9 }
 0xa13   :  { %2714 = vmatmul.mubr.msk.bf16.vlgmr.msra.gmra.mrb[16].mxu0 %vm264_vm6, %v999_v11 }
 0xa14   :  { %2733 = vmatprep.mubr.msk.bf16.mxu0 %vm3128_vm7, %v3127_v62  ;;  %2730 = vmatpush3.bf16.msra.mxu0 %v2944_v3 }
 0xa15   :  { %2731 = vmatprep.subr.bf16.mxu0 %v3127_v62 }
 0xa18   :  { %2732 = vmatpush3.bf16.msra.mxu0 %v2945_v4 }
 0xa19   :  { %2737 = vmatprep.subr.bf16.mxu0 %v3127_v62 }
 0xae6   :  { %v1056_v19 = vpop.f32.mrb[16].mxu0 }
 0xae7   :  { %v1057_v20 = vadd.f32 %v2441_v18, %v1056_v19  ;;  %v2715_v21 = vpop.f32.mrb[17].mxu0  ;;  %v2452_v19 = vld [vmem:[%s3685_s7] ss:$0 sm:$0xff] }
 0xae8   :  { %v1059_v23 = vpop.f32.mrb[18].mxu0 }
 0xae9   :  { %v1065_v24 = vmul.f32 0.044715, %v1057_v20  ;;  %v1060_v25 = vadd.f32 %v2441_v18, %v1059_v23  ;;  %v2716_v27 = vpop.f32.mrb[19].mxu0  ;;  %v1063_v42 = vmul.f32 0.5, %v1057_v20 }
 0xaeb   :  { %v1067_v28 = vmul.f32 %v1065_v24, %v1057_v20  ;;  %v1066_v29 = vmul.f32 0.044715, %v1060_v25  ;;  %v1064_v43 = vmul.f32 0.5, %v1060_v25 }
 0xaed   :  { %v1069_v30 = vmul.f32 %v1067_v28, %v1057_v20  ;;  %v1068_v33 = vmul.f32 %v1066_v29, %v1060_v25 }
 0xaef   :  { %v1071_v36 = vadd.f32 %v1069_v30, %v1057_v20  ;;  %v1070_v37 = vmul.f32 %v1068_v33, %v1060_v25 }
 0xaf1   :  { %v1073_v38 = vmul.f32 0.7978846, %v1071_v36  ;;  %v1072_v26 = vadd.f32 %v1070_v37, %v1060_v25  ;;  %v2458_v25 = vld [vmem:[%s3197_s19 + $0x1] ss:$0 sm:$0xff]  ;;  %s3687_s19 = sld [smem:[#allocation16_spill]] }
 0xaf3   :  { %2984 = vtanh.f32 %v1073_v38  ;;  %v1074_v39 = vmul.f32 0.7978846, %v1072_v26 }
 0xaf5   :  { %2986 = vtanh.f32 %v1074_v39 }
 0xafd   :  { %v2985_v40 = vpop.eup %2984 }
 0xafe   :  { %v1077_v22 = vadd.f32 1.0, %v2985_v40 }
 0xaff   :  { %v2987_v41 = vpop.eup %2986 }
 0xb00   :  { %v1078_v44 = vadd.f32 1.0, %v2987_v41  ;;  %v1079_v45 = vmul.f32 %v1077_v22, %v1063_v42 }
 0xb02   :  { %v1080_v46 = vmul.f32 %v1078_v44, %v1064_v43 }
 0xb04   :  { %v1089_v47 = vpack.c.bf16 %v1080_v46, %v1079_v45 }
 0xb06   :  { %2726 = vmatmul.mubr.msk.bf16.vlgmr.msra.gmra.mrb[28].mxu1 %vm1121_vm11, %v1089_v47 }
 0xb07   :  { %2745 = vmatprep.mubr.msk.bf16.mxu1 %vm3128_vm7, %v3127_v62 }
 0xbd9   :  { %v1159_v49 = vpop.f32.mrb[28].mxu1 }
 0xbda   :  { %v1160_v50 = vadd.f32 %v2445_v48, %v1159_v49  ;;  %v2727_v51 = vpop.f32.mrb[29].mxu1 }
 0xbdb   :  { %v1162_v52 = vpop.f32.mrb[30].mxu1 }
 0xbdc   :  { %v1163_v54 = vadd.f32 %v2445_v48, %v1162_v52  ;;  %v2728_v55 = vpop.f32.mrb[31].mxu1  ;;  %v1166_v56 = vadd.f32 %v1160_v50, %v993_v9 }
 0xbde   :  { %v1170_v57 = vsel %vm264_vm6, %v1166_v56, 0.0  ;;  %v1167_v14 = vadd.f32 %v1163_v54, %v994_v10 }
 0xbdf   :  { %1171 = vadd.xlane.f32.xlu1 %v1170_v57 }
 0xbe0   :  { %v1173_v58 = vsel %vm264_vm6, %v1167_v14, 0.0 }
 0xbe1   :  { %1174 = vadd.xlane.f32.xlu0 %v1173_v58 }
 0xc6c   :  { %v1172_v15 = vpop.xlane.xlu1 %1171 }
 0xc6d   :  { %v1176_v59 = vmul.f32 0.03125, %v1172_v15 }
 0xc6e   :  { %v1175_v34 = vpop.xlane.xlu0 %1174 }
 0xc6f   :  { %v1178_v35 = vsub.f32 %v1166_v56, %v1176_v59  ;;  %v1177_v60 = vmul.f32 0.03125, %v1175_v34 }
 0xc71   :  { %v1179_v61 = vsub.f32 %v1167_v14, %v1177_v60  ;;  %v1180_v63 = vmul.f32 %v1178_v35, %v1178_v35 }
 0xc73   :  { %v1182_v0 = vsel %vm264_vm6, %v1180_v63, 0.0  ;;  %v1181_v1 = vmul.f32 %v1179_v61, %v1179_v61 }
 0xc74   :  { %1183 = vadd.xlane.f32.xlu1 %v1182_v0 }
 0xc75   :  { %v1185_v2 = vsel %vm264_vm6, %v1181_v1, 0.0 }
 0xc76   :  { %1186 = vadd.xlane.f32.xlu0 %v1185_v2 }
 0xd01   :  { %v1184_v5 = vpop.xlane.xlu1 %1183 }
 0xd02   :  { %v1188_v6 = vmul.f32 0.03125, %v1184_v5 }
 0xd03   :  { %v1187_v7 = vpop.xlane.xlu0 %1186 }
 0xd04   :  { %v1190_v8 = vadd.f32 1e-12, %v1188_v6  ;;  %v1189_v9 = vmul.f32 0.03125, %v1187_v7 }
 0xd06   :  { %2988 = vrsqrt.f32 %v1190_v8  ;;  %v1191_v10 = vadd.f32 1e-12, %v1189_v9 }
 0xd08   :  { %2990 = vrsqrt.f32 %v1191_v10 }
 0xd10   :  { %v2989_v11 = vpop.eup %2988 }
 0xd11   :  { %v1194_v13 = vmul.f32 %v2989_v11, %v1178_v35 }
 0xd12   :  { %v2991_v16 = vpop.eup %2990 }
 0xd13   :  { %v1202_v17 = vmul.f32 %v2451_v12, %v1194_v13  ;;  %v1195_v18 = vmul.f32 %v2991_v16, %v1179_v61 }
 0xd15   :  { %v1203_v20 = vmul.f32 %v2451_v12, %v1195_v18  ;;  %v3484_v21 = vadd.f32 %v2452_v19, %v1202_v17 }
 0xd17   :  { %v3486_v23 = vadd.f32 %v2452_v19, %v1203_v20 }
 0xd19   :  { %v1217_v24 = vpack.c.bf16 %v3486_v23, %v3484_v21 }
 0xd1b   :  { %2734 = vmatmul.mubr.msk.bf16.vlgmr.msra.gmra.mrb[20].mxu0 %vm264_vm6, %v1217_v24 }
 0xd1c   :  { %2739 = vmatprep.mubr.msk.bf16.mxu0 %vm3128_vm7, %v3127_v62 }
 0xdee   :  { %v1275_v27 = vpop.f32.mrb[20].mxu0 }
 0xdef   :  { %v1276_v28 = vadd.f32 %v2458_v25, %v1275_v27  ;;  %v2735_v29 = vpop.f32.mrb[21].mxu0 }
 0xdf0   :  { %v1278_v30 = vpop.f32.mrb[22].mxu0 }
 0xdf1   :  { %v3494_v33 = vpack.c.bf16 %v1276_v28, %v1276_v28  ;;  %v1279_v36 = vadd.f32 %v2458_v25, %v1278_v30  ;;  %v2736_v37 = vpop.f32.mrb[23].mxu0 }
 0xdf3   :  { %v2924_v38 = vpack.i.bf16 %v1279_v36, %v1276_v28  ;;  %1295 = vrot.lane.b32.xlu0 %v3494_v33, %s3129_s0  ;;  %v3499_v26 = vpack.c.bf16 %v1279_v36, %v1279_v36 }
 0xdf5   :  { %2925 = vrot.lane.b32.xlu1 %v2924_v38, %s3130_s5 }
 0xdf9   :  { %1344 = vrot.lane.b32.xlu1 %v3499_v26, %s3129_s0 }
 0xe65   :  { %v1296_v39 = vpop.permute.xlu0 %1295 }
 0xe66   :  { %v1301_v40 = vsel %vm427_vm8, %v1296_v39, 0 }
 0xe67   :  { %2738 = vmatpush3.bf16.xpose.msra.mxu0 %v1301_v40  ;;  %v2926_v22 = vpop.permute.xlu1 %2925 }
 0xe68   :  { %v2928_v41 = vunpack.i.h.bf16 %v2926_v22  ;;  %v2927_v42 = vunpack.i.l.bf16 %v2926_v22  ;;  %2749 = vmatprep.subr.bf16.mxu0 %v3127_v62 }
 0xe6a   :  { %v3505_v43 = vpack.c.bf16 %v2928_v41, %v2928_v41  ;;  %v3507_v44 = vpack.c.bf16 %v2927_v42, %v2927_v42 }
 0xe6b   :  { %v1345_v45 = vpop.permute.xlu1 %1344 }
 0xe6c   :  { %v1350_v46 = vsel %vm427_vm8, %v1345_v45, 0  ;;  %1442 = vrot.lane.b32.xlu0 %v3505_v43, %s3129_s0  ;;  %1393 = vrot.lane.b32.xlu1 %v3507_v44, %s3129_s0 }
 0xe6d   :  { %2744 = vmatpush3.bf16.xpose.msra.mxu1 %v1350_v46 }
 0xe6e   :  { %2740 = vmatmul.mubr.msk.bf16.vlgmr.msra.gmra.mrb[24].mxu0 %vm427_vm8, %v3494_v33  ;;  %2755 = vmatprep.subr.bf16.mxu1 %v3127_v62 }
 0xe6f   :  { %2751 = vmatprep.mubr.msk.bf16.mxu0 %vm3128_vm7, %v3127_v62 }
 0xe74   :  { %2746 = vmatmul.mubr.msk.bf16.vlgmr.msra.gmra.mrb[32].mxu1 %vm427_vm8, %v3499_v26 }
 0xe75   :  { %2757 = vmatprep.mubr.msk.bf16.mxu1 %vm3128_vm7, %v3127_v62 }
 0xede   :  { %v1443_v47 = vpop.permute.xlu0 %1442  ;;  %v1394_v48 = vpop.permute.xlu1 %1393 }
 0xedf   :  { %v1448_v49 = vsel %vm427_vm8, %v1443_v47, 0  ;;  %v1399_v50 = vsel %vm427_vm8, %v1394_v48, 0 }
 0xee0   :  { %2750 = vmatpush3.bf16.xpose.msra.mxu0 %v1399_v50  ;;  %2756 = vmatpush3.bf16.xpose.msra.mxu1 %v1448_v49 }
 0xee1   :  { %2761 = vmatprep.subr.bf16.mxu0 %v3127_v62  ;;  %2767 = vmatprep.subr.bf16.mxu1 %v3127_v62 }
 0xee7   :  { %2752 = vmatmul.mubr.msk.bf16.vlgmr.msra.gmra.mrb[28].mxu0 %vm427_vm8, %v3507_v44  ;;  %2758 = vmatmul.mubr.msk.bf16.vlgmr.msra.gmra.mrb[36].mxu1 %vm427_vm8, %v3505_v43 }
 0xee8   :  { %2763 = vmatprep.mubr.msk.bf16.mxu0 %vm3128_vm7, %v3127_v62  ;;  %2769 = vmatprep.mubr.msk.bf16.mxu1 %vm3128_vm7, %v3127_v62 }
 0xf41   :  { %v1337_v51 = vpop.f32.mrb[24].mxu0 }
 0xf42   :  { %v1490_v52 = vmul.f32 0.25, %v1337_v51  ;;  %v2741_v54 = vpop.f32.mrb[25].mxu0 }
 0xf43   :  { %v1340_v55 = vpop.f32.mrb[26].mxu0 }
 0xf44   :  { %v2742_v56 = vpop.f32.mrb[27].mxu0  ;;  %v1494_v57 = vadd.f32 %v1490_v52, %v3391_v53 }
 0xf46   :  { %v1498_v14 = vsel %vm629_vm9, %v1494_v57, -inf }
 0xf47   :  { %1499 = vmax.xlane.f32.xlu1 %v1498_v14  ;;  %v1386_v58 = vpop.f32.mrb[32].mxu1 }
 0xf48   :  { %v1491_v15 = vmul.f32 0.25, %v1386_v58  ;;  %v2747_v59 = vpop.f32.mrb[33].mxu1 }
 0xf49   :  { %v1389_v34 = vpop.f32.mrb[34].mxu1 }
 0xf4a   :  { %v2748_v35 = vpop.f32.mrb[35].mxu1  ;;  %v1495_v60 = vadd.f32 %v1491_v15, %v3395_v31 }
 0xf4c   :  { %v1501_v61 = vsel %vm629_vm9, %v1495_v60, -inf }
 0xf4d   :  { %1502 = vmax.xlane.f32.xlu0 %v1501_v61 }
 0xfba   :  { %v1435_v63 = vpop.f32.mrb[28].mxu0  ;;  %v1484_v0 = vpop.f32.mrb[36].mxu1 }
 0xfbb   :  { %v1492_v1 = vmul.f32 0.25, %v1435_v63  ;;  %v1493_v2 = vmul.f32 0.25, %v1484_v0  ;;  %v2753_v3 = vpop.f32.mrb[29].mxu0  ;;  %v2759_v4 = vpop.f32.mrb[37].mxu1 }
 0xfbc   :  { %v1438_v5 = vpop.f32.mrb[30].mxu0  ;;  %v1487_v6 = vpop.f32.mrb[38].mxu1 }
 0xfbd   :  { %v2754_v7 = vpop.f32.mrb[31].mxu0  ;;  %v2760_v8 = vpop.f32.mrb[39].mxu1  ;;  %v1496_v9 = vadd.f32 %v1492_v1, %v3391_v53  ;;  %v1497_v10 = vadd.f32 %v1493_v2, %v3395_v31  ;;  %v2947_v6 = vld [vmem:[%s3202_s24 + $0x18] sm:$0xff]  }
 0xfbf   :  { %v1504_v11 = vsel %vm629_vm9, %v1496_v9, -inf  ;;  %v1507_v12 = vsel %vm629_vm9, %v1497_v10, -inf }
 0xfc0   :  { %1505 = vmax.xlane.f32.xlu0 %v1504_v11  ;;  %1508 = vmax.xlane.f32.xlu1 %v1507_v12 }
 0xfd1   :  { %1594 = vrot.lane.b32.xlu1 %v3499_v26, %s3132_s9 }
 0xfd4   :  { %v1500_v13 = vpop.xlane.xlu1 %1499 }
 0xfd5   :  { %v1510_v17 = vsub.f32 %v1494_v57, %v1500_v13 }
 0xfd6   :  { %1546 = vrot.lane.b32.xlu0 %v3494_v33, %s3132_s9 }
 0xfd7   :  { %v1514_v19 = vmul.f32 1.442695, %v1510_v17 }
 0xfd9   :  { %2992 = vpow2.f32 %v1514_v19 }
 0xfda   :  { %v1503_v16 = vpop.xlane.xlu0 %1502 }
 0xfdb   :  { %v1511_v18 = vsub.f32 %v1495_v60, %v1503_v16  ;;  %v2946_v60 = vld [vmem:[%s3202_s24 + $0x10] sm:$0xff]   ;;  %s3688_s24 = sld [smem:[#allocation18_spill]] }
 0xfdd   :  { %v1516_v53 = vmul.f32 1.442695, %v1511_v18 }
 0xfdf   :  { %2994 = vpow2.f32 %v1516_v53 }
 0xfe3   :  { %v2993_v31 = vpop.eup %2992 }
 0xfe4   :  { %v1522_v24 = vsel %vm629_vm9, %v2993_v31, 0.0 }
 0xfe9   :  { %v2995_v20 = vpop.eup %2994 }
 0xfea   :  { %v1525_v25 = vsel %vm629_vm9, %v2995_v20, 0.0 }
 0xff5   :  { %1523 = vadd.xlane.f32.xlu0 %v1522_v24  ;;  %1526 = vadd.xlane.f32.xlu1 %v1525_v25  ;;  %v2475_v25 = vld [vmem:[%s3207_s30 + $0x1] ss:$0 sm:$0xff]  ;;  %s3689_s30 = sld [smem:[#allocation17_spill]] }
0x104d   :  { %v1506_v27 = vpop.xlane.xlu0 %1505  ;;  %v1509_v28 = vpop.xlane.xlu1 %1508 }
0x104e   :  { %v1512_v29 = vsub.f32 %v1496_v9, %v1506_v27  ;;  %v1513_v30 = vsub.f32 %v1497_v10, %v1509_v28 }
0x1050   :  { %v1518_v33 = vmul.f32 1.442695, %v1512_v29  ;;  %v1520_v36 = vmul.f32 1.442695, %v1513_v30 }
0x1051   :  { %v1547_v37 = vpop.permute.xlu0 %1546  ;;  %v1595_v38 = vpop.permute.xlu1 %1594 }
0x1052   :  { %2996 = vpow2.f32 %v1518_v33  ;;  %v1552_v26 = vsel %vm683_vm10, %v1547_v37, 0  ;;  %v1600_v39 = vsel %vm683_vm10, %v1595_v38, 0 }
0x1053   :  { %2998 = vpow2.f32 %v1520_v36  ;;  %2762 = vmatpush3.bf16.msra.mxu0 %v1552_v26  ;;  %2768 = vmatpush3.bf16.msra.mxu1 %v1600_v39 }
0x1054   :  { %2773 = vmatprep.subr.bf16.mxu0 %v3127_v62  ;;  %2779 = vmatprep.subr.bf16.mxu1 %v3127_v62 }
0x105c   :  { %v2997_v40 = vpop.eup %2996 }
0x105d   :  { %v2999_v22 = vpop.eup %2998  ;;  %v1528_v41 = vsel %vm629_vm9, %v2997_v40, 0.0 }
0x105e   :  { %1529 = vadd.xlane.f32.xlu0 %v1528_v41  ;;  %v1531_v42 = vsel %vm629_vm9, %v2999_v22, 0.0 }
0x105f   :  { %1532 = vadd.xlane.f32.xlu1 %v1531_v42 }
0x1070   :  { %1642 = vrot.lane.b32.xlu1 %v3507_v44, %s3132_s9 }
0x1074   :  { %1690 = vrot.lane.b32.xlu0 %v3505_v43, %s3132_s9 }
0x1082   :  { %v1524_v45 = vpop.xlane.xlu0 %1523  ;;  %v1527_v46 = vpop.xlane.xlu1 %1526 }
0x1083   :  { %3000 = vrcp.f32 %v1524_v45 }
0x1084   :  { %3002 = vrcp.f32 %v1527_v46 }
0x108d   :  { %v3001_v47 = vpop.eup %3000 }
0x108e   :  { %v3003_v48 = vpop.eup %3002  ;;  %v1538_v49 = vmul.f32 %v3001_v47, %v2993_v31 }
0x108f   :  { %v1539_v50 = vmul.f32 %v3003_v48, %v2995_v20 }
0x1090   :  { %v1542_v51 = vpack.c.bf16 %v1538_v49, %v1538_v49 }
0x1091   :  { %v1543_v52 = vpack.c.bf16 %v1539_v50, %v1539_v50  ;;  %v2949_v50 = vld [vmem:[%s3222_s20 + $0x18] sm:$0xff]  }
0x1092   :  { %2764 = vmatmul.mubr.msk.bf16.vlgmr.msra.gmra.mrb[32].mxu0 %vm629_vm9, %v1542_v51 }
0x1093   :  { %2770 = vmatmul.mubr.msk.bf16.vlgmr.msra.gmra.mrb[40].mxu1 %vm629_vm9, %v1543_v52  ;;  %2775 = vmatprep.mubr.msk.bf16.mxu0 %vm3128_vm7, %v3127_v62 }
0x1094   :  { %2781 = vmatprep.mubr.msk.bf16.mxu1 %vm3128_vm7, %v3127_v62 }
0x10eb   :  { %v1530_v43 = vpop.xlane.xlu0 %1529 }
0x10ec   :  { %3004 = vrcp.f32 %v1530_v43  ;;  %v1533_v44 = vpop.xlane.xlu1 %1532 }
0x10ed   :  { %3006 = vrcp.f32 %v1533_v44 }
0x10ef   :  { %v1691_v54 = vpop.permute.xlu0 %1690 }
0x10f0   :  { %v1696_v55 = vsel %vm683_vm10, %v1691_v54, 0  ;;  %v1643_v56 = vpop.permute.xlu1 %1642 }
0x10f1   :  { %v1648_v57 = vsel %vm683_vm10, %v1643_v56, 0  ;;  %2780 = vmatpush3.bf16.msra.mxu1 %v1696_v55 }
0x10f2   :  { %2774 = vmatpush3.bf16.msra.mxu0 %v1648_v57  ;;  %2793 = vmatprep.subr.bf16.mxu1 %v3127_v62 }
0x10f3   :  { %2785 = vmatprep.subr.bf16.mxu0 %v3127_v62 }
0x10f6   :  { %v3005_v14 = vpop.eup %3004 }
0x10f7   :  { %v3007_v58 = vpop.eup %3006  ;;  %v1540_v15 = vmul.f32 %v3005_v14, %v2997_v40  ;;  %v2481_v14 = vld [vmem:[%s3212_s6 + $0x1] ss:$0 sm:$0xff]  ;;  %s3690_s6 = sld [smem:[#allocation19_spill]] }
0x10f8   :  { %v1541_v59 = vmul.f32 %v3007_v58, %v2999_v22 }
0x10f9   :  { %v1544_v34 = vpack.c.bf16 %v1540_v15, %v1540_v15 }
0x10fa   :  { %v1545_v35 = vpack.c.bf16 %v1541_v59, %v1541_v59 }
0x10fb   :  { %2776 = vmatmul.mubr.msk.bf16.vlgmr.msra.gmra.mrb[36].mxu0 %vm629_vm9, %v1544_v34  ;;  %v2482_v34 = vld [vmem:[%s3680_s21 + $0x1] ss:$0 sm:$0xff] }
0x10fc   :  { %2782 = vmatmul.mubr.msk.bf16.vlgmr.msra.gmra.mrb[44].mxu1 %vm629_vm9, %v1545_v35  ;;  %2789 = vmatprep.mubr.msk.bf16.mxu0 %vm3128_vm7, %v3127_v62 }
0x10fd   :  { %2797 = vmatprep.mubr.msk.bf16.mxu1 %vm3128_vm7, %v3127_v62  ;;  %2786 = vmatpush3.bf16.msra.mxu0 %v2946_v60 }
0x10fe   :  { %2787 = vmatprep.subr.bf16.mxu0 %v3127_v62 }
0x1101   :  { %2788 = vmatpush3.bf16.msra.mxu0 %v2947_v6 }
0x1102   :  { %2801 = vmatprep.subr.bf16.mxu0 %v3127_v62 }
0x1165   :  { %v1588_v61 = vpop.f32.mrb[32].mxu0 }
0x1166   :  { %v1636_v63 = vpop.f32.mrb[40].mxu1  ;;  %v2765_v0 = vpop.f32.mrb[33].mxu0 }
0x1167   :  { %v2771_v1 = vpop.f32.mrb[41].mxu1  ;;  %v1591_v2 = vpop.f32.mrb[34].mxu0  ;;  %v2950_v0 = vld [vmem:[%s3681_s25 + $0x20] sm:$0xff]  }
0x1168   :  { %v1639_v3 = vpop.f32.mrb[42].mxu1  ;;  %v2766_v4 = vpop.f32.mrb[35].mxu0  ;;  %v2951_v1 = vld [vmem:[%s3681_s25 + $0x28] sm:$0xff]   ;;  %v2952_v2 = vld [vmem:[%s3681_s25 + $0x30] sm:$0xff]  }
0x1169   :  { %v2772_v5 = vpop.f32.mrb[43].mxu1  ;;  %v2953_v3 = vld [vmem:[%s3681_s25 + $0x38] sm:$0xff]   ;;  %v2488_v4 = vld [vmem:[%s3682_s29 + $0x1] ss:$0 sm:$0xff] }
0x11ce   :  { %v1684_v7 = vpop.f32.mrb[36].mxu0 }
0x11cf   :  { %v1732_v8 = vpop.f32.mrb[44].mxu1  ;;  %v2777_v9 = vpop.f32.mrb[37].mxu0 }
0x11d0   :  { %v2929_v10 = vpack.i.bf16 %v1732_v8, %v1684_v7  ;;  %v2783_v11 = vpop.f32.mrb[45].mxu1  ;;  %v1687_v12 = vpop.f32.mrb[38].mxu0 }
0x11d1   :  { %v1735_v13 = vpop.f32.mrb[46].mxu1  ;;  %v2778_v16 = vpop.f32.mrb[39].mxu0 }
0x11d2   :  { %2930 = vrot.lane.b32.xlu1 %v2929_v10, %s3133_s13  ;;  %v2784_v17 = vpop.f32.mrb[47].mxu1 }
0x1244   :  { %v2931_v18 = vpop.permute.xlu1 %2930 }
0x1245   :  { %v2933_v19 = vunpack.i.h.bf16 %v2931_v18  ;;  %v2932_v53 = vunpack.i.l.bf16 %v2931_v18 }
0x1247   :  { %v1747_v31 = vsel %vm427_vm8, %v1636_v63, %v2933_v19  ;;  %v1746_v20 = vsel %vm427_vm8, %v1588_v61, %v2932_v53 }
0x1248   :  { %v1753_v24 = vpack.c.bf16 %v1747_v31, %v1746_v20 }
0x124a   :  { %2790 = vmatmul.mubr.msk.bf16.vlgmr.msra.gmra.mrb[40].mxu0 %vm264_vm6, %v1753_v24 }
0x124b   :  { %2809 = vmatprep.mubr.msk.bf16.mxu0 %vm3128_vm7, %v3127_v62  ;;  %2802 = vmatpush3.bf16.msra.mxu0 %v2950_v0  ;;  %v2509_v0 = vld [vmem:[%s3684_s8 + $0x1] ss:$0 sm:$0xff] }
0x124c   :  { %2803 = vmatprep.subr.bf16.mxu0 %v3127_v62 }
0x124f   :  { %2804 = vmatpush3.bf16.msra.mxu0 %v2951_v1 }
0x1250   :  { %2805 = vmatprep.subr.bf16.mxu0 %v3127_v62 }
0x1253   :  { %2806 = vmatpush3.bf16.msra.mxu0 %v2952_v2 }
0x1254   :  { %2807 = vmatprep.subr.bf16.mxu0 %v3127_v62 }
0x1257   :  { %2808 = vmatpush3.bf16.msra.mxu0 %v2953_v3  ;;  %v2510_v3 = vld [vmem:[%s3685_s7 + $0x1] ss:$0 sm:$0xff] }
0x1258   :  { %2829 = vmatprep.subr.bf16.mxu0 %v3127_v62 }
0x131d   :  { %v1811_v27 = vpop.f32.mrb[40].mxu0 }
0x131e   :  { %v1812_v28 = vadd.f32 %v2475_v25, %v1811_v27  ;;  %v2791_v29 = vpop.f32.mrb[41].mxu0 }
0x131f   :  { %v1814_v30 = vpop.f32.mrb[42].mxu0 }
0x1320   :  { %v1815_v33 = vadd.f32 %v2475_v25, %v1814_v30  ;;  %v2792_v36 = vpop.f32.mrb[43].mxu0  ;;  %v1818_v37 = vadd.f32 %v1812_v28, %v3484_v21 }
0x1322   :  { %v1824_v38 = vsel %vm264_vm6, %v1818_v37, 0.0  ;;  %v1819_v26 = vadd.f32 %v1815_v33, %v3486_v23  ;;  %v2948_v23 = vld [vmem:[%s3222_s20 + $0x10] sm:$0xff]   ;;  %s3691_s20 = sld [smem:[#allocation9_spill]] }
0x1323   :  { %1825 = vadd.xlane.f32.xlu0 %v1824_v38  ;;  %2794 = vmatpush3.bf16.msra.mxu1 %v2948_v23  ;;  %v2501_v38 = vld [vmem:[%s3683_s3 + $0x1] ss:$0 sm:$0xff] }
0x1324   :  { %v1827_v39 = vsel %vm264_vm6, %v1819_v26, 0.0  ;;  %2795 = vmatprep.subr.bf16.mxu1 %v3127_v62 }
0x1325   :  { %1828 = vadd.xlane.f32.xlu1 %v1827_v39 }
0x1327   :  { %2796 = vmatpush3.bf16.msra.mxu1 %v2949_v50 }
0x1328   :  { %2813 = vmatprep.subr.bf16.mxu1 %v3127_v62 }
0x13b0   :  { %v1826_v40 = vpop.xlane.xlu0 %1825 }
0x13b1   :  { %v1830_v22 = vmul.f32 0.03125, %v1826_v40 }
0x13b2   :  { %v1829_v41 = vpop.xlane.xlu1 %1828 }
0x13b3   :  { %v1832_v42 = vsub.f32 %v1818_v37, %v1830_v22  ;;  %v1831_v45 = vmul.f32 0.03125, %v1829_v41 }
0x13b5   :  { %v1833_v46 = vsub.f32 %v1819_v26, %v1831_v45  ;;  %v1834_v47 = vmul.f32 %v1832_v42, %v1832_v42 }
0x13b7   :  { %v1836_v48 = vsel %vm264_vm6, %v1834_v47, 0.0  ;;  %v1835_v21 = vmul.f32 %v1833_v46, %v1833_v46 }
0x13b8   :  { %1837 = vadd.xlane.f32.xlu0 %v1836_v48 }
0x13b9   :  { %v1839_v49 = vsel %vm264_vm6, %v1835_v21, 0.0 }
0x13bc   :  { %1840 = vadd.xlane.f32.xlu0 %v1839_v49 }
0x1445   :  { %v1838_v51 = vpop.xlane.xlu0 %1837 }
0x1446   :  { %v1842_v52 = vmul.f32 0.03125, %v1838_v51 }
0x1448   :  { %v1844_v43 = vadd.f32 1e-12, %v1842_v52 }
0x1449   :  { %v1841_v44 = vpop.xlane.xlu0 %1840 }
0x144a   :  { %3008 = vrsqrt.f32 %v1844_v43  ;;  %v1843_v54 = vmul.f32 0.03125, %v1841_v44 }
0x144c   :  { %v1845_v55 = vadd.f32 1e-12, %v1843_v54 }
0x144e   :  { %3010 = vrsqrt.f32 %v1845_v55 }
0x1454   :  { %v3009_v56 = vpop.eup %3008 }
0x1455   :  { %v1848_v57 = vmul.f32 %v3009_v56, %v1832_v42  ;;  %v2954_v56 = vld [vmem:[%s3686_s14] sm:$0xff]  }
0x1457   :  { %v1856_v15 = vmul.f32 %v2481_v14, %v1848_v57  ;;  %v2955_v57 = vld [vmem:[%s3686_s14 + $0x8] sm:$0xff]  }
0x1458   :  { %v3011_v58 = vpop.eup %3010 }
0x1459   :  { %v1849_v59 = vmul.f32 %v3011_v58, %v1833_v46  ;;  %v1864_v60 = vadd.f32 %v2482_v34, %v1856_v15  ;;  %v2957_v58 = vld [vmem:[%s3687_s19 + $0x8] sm:$0xff]  }
0x145b   :  { %v1857_v35 = vmul.f32 %v2481_v14, %v1849_v59  ;;  %v2956_v14 = vld [vmem:[%s3687_s19] sm:$0xff]  }
0x145d   :  { %v1865_v61 = vadd.f32 %v2482_v34, %v1857_v35 }
0x145f   :  { %v1871_v63 = vpack.c.bf16 %v1865_v61, %v1864_v60 }
0x1461   :  { %2798 = vmatmul.mubr.msk.bf16.vlgmr.msra.gmra.mrb[48].mxu1 %vm264_vm6, %v1871_v63 }
0x1462   :  { %2817 = vmatprep.mubr.msk.bf16.mxu1 %vm3128_vm7, %v3127_v62  ;;  %2814 = vmatpush3.bf16.msra.mxu1 %v2956_v14 }
0x1463   :  { %2815 = vmatprep.subr.bf16.mxu1 %v3127_v62 }
0x1466   :  { %2816 = vmatpush3.bf16.msra.mxu1 %v2957_v58 }
0x1467   :  { %2821 = vmatprep.subr.bf16.mxu1 %v3127_v62 }
0x1534   :  { %v1929_v5 = vpop.f32.mrb[48].mxu1 }
0x1535   :  { %v1930_v6 = vadd.f32 %v2488_v4, %v1929_v5  ;;  %v2799_v7 = vpop.f32.mrb[49].mxu1 }
0x1536   :  { %v1932_v8 = vpop.f32.mrb[50].mxu1 }
0x1537   :  { %v1938_v9 = vmul.f32 0.044715, %v1930_v6  ;;  %v1933_v10 = vadd.f32 %v2488_v4, %v1932_v8  ;;  %v2800_v11 = vpop.f32.mrb[51].mxu1  ;;  %v1936_v28 = vmul.f32 0.5, %v1930_v6 }
0x1539   :  { %v1940_v12 = vmul.f32 %v1938_v9, %v1930_v6  ;;  %v1939_v13 = vmul.f32 0.044715, %v1933_v10  ;;  %v1937_v29 = vmul.f32 0.5, %v1933_v10 }
0x153b   :  { %v1942_v16 = vmul.f32 %v1940_v12, %v1930_v6  ;;  %v1941_v17 = vmul.f32 %v1939_v13, %v1933_v10 }
0x153d   :  { %v1944_v18 = vadd.f32 %v1942_v16, %v1930_v6  ;;  %v1943_v19 = vmul.f32 %v1941_v17, %v1933_v10 }
0x153f   :  { %v1946_v53 = vmul.f32 0.7978846, %v1944_v18  ;;  %v1945_v31 = vadd.f32 %v1943_v19, %v1933_v10  ;;  %v2958_v19 = vld [vmem:[%s3688_s24] sm:$0xff]  }
0x1541   :  { %3012 = vtanh.f32 %v1946_v53  ;;  %v1947_v20 = vmul.f32 0.7978846, %v1945_v31  ;;  %v2959_v53 = vld [vmem:[%s3688_s24 + $0x8] sm:$0xff]   ;;  %v2519_v31 = vld [vmem:[%s3277_s17] ss:$0 sm:$0xff]  ;;  %s3134_s17 = smov [#allocation4]  }
0x1542   :  { %s2357_s10 = sshll.u32 %s3134_s17, 4  ;;  %s2358_s10 = int_to_ptr.vmem [resolvable:$true] %s2357_s10 }
0x1543   :  { %3014 = vtanh.f32 %v1947_v20  ;;  %s3026_s11 = scalar_lea.vmem %s2358_s10, 256  ;;  %p3031_p1 = scmp.lt.s32.totalorder %s2358_s10, %s2358_s10 }
0x1544   :  { %p3027_p0 = scmp.ne.s32.totalorder %s2358_s10, %s3026_s11  ;;  %p3032_p2 = scmp.lt.s32.totalorder %s3026_s11, %s3026_s11 }
0x1546   :  { %p3033_p3 = por %p3032_p2, %p3031_p1 }
0x1548   :  { %p3034_p4 = pnand %p3033_p3, %p3027_p0 }
0x154b   :  { %v3013_v24 = vpop.eup %3012 }
0x154c   :  { %v1950_v25 = vadd.f32 1.0, %v3013_v24 }
0x154d   :  { %v3015_v27 = vpop.eup %3014 }
0x154e   :  { %v1951_v30 = vadd.f32 1.0, %v3015_v27  ;;  %v1952_v33 = vmul.f32 %v1950_v25, %v1936_v28 }
0x1550   :  { %v1953_v36 = vmul.f32 %v1951_v30, %v1937_v29  ;;  %v2511_v30 = vld [vmem:[%s3689_s30] ss:$0 sm:$0xff] }
0x1552   :  { %v1963_v37 = vpack.c.bf16 %v1953_v36, %v1952_v33 }
0x1554   :  { %2810 = vmatmul.mubr.msk.bf16.vlgmr.msra.gmra.mrb[44].mxu0 %vm1121_vm11, %v1963_v37 }
0x1555   :  { %2833 = vmatprep.mubr.msk.bf16.mxu0 %vm3128_vm7, %v3127_v62  ;;  %2830 = vmatpush3.bf16.msra.mxu0 %v2954_v56 }
0x1556   :  { %2831 = vmatprep.subr.bf16.mxu0 %v3127_v62 }
0x1559   :  { %2832 = vmatpush3.bf16.msra.mxu0 %v2955_v57 }
0x1627   :  { %v2033_v26 = vpop.f32.mrb[44].mxu0 }
0x1628   :  { %v2034_v39 = vadd.f32 %v2501_v38, %v2033_v26  ;;  %v2811_v40 = vpop.f32.mrb[45].mxu0 }
0x1629   :  { %v2036_v22 = vpop.f32.mrb[46].mxu0  ;;  %v2515_v40 = vld [vmem:[%s3690_s6] ss:$0 sm:$0xff] }
0x162a   :  { %v2037_v41 = vadd.f32 %v2501_v38, %v2036_v22  ;;  %v2812_v42 = vpop.f32.mrb[47].mxu0  ;;  %v2040_v45 = vadd.f32 %v2034_v39, %v1864_v60 }
0x162c   :  { %v2046_v46 = vsel %vm264_vm6, %v2040_v45, 0.0  ;;  %v2041_v47 = vadd.f32 %v2037_v41, %v1865_v61 }
0x162d   :  { %2047 = vadd.xlane.f32.xlu0 %v2046_v46 }
0x162e   :  { %v2049_v48 = vsel %vm264_vm6, %v2041_v47, 0.0 }
0x162f   :  { %2050 = vadd.xlane.f32.xlu1 %v2049_v48 }
0x16ba   :  { %v2048_v21 = vpop.xlane.xlu0 %2047 }
0x16bb   :  { %v2052_v49 = vmul.f32 0.03125, %v2048_v21  ;;  %v2233_v21 = vld [vmem:[%s3691_s20] sm:$0x3] }
0x16bc   :  { %v2051_v23 = vpop.xlane.xlu1 %2050 }
0x16bd   :  { %v2054_v50 = vsub.f32 %v2040_v45, %v2052_v49  ;;  %v2053_v51 = vmul.f32 0.03125, %v2051_v23 }
0x16bf   :  { %v2055_v52 = vsub.f32 %v2041_v47, %v2053_v51  ;;  %v2056_v43 = vmul.f32 %v2054_v50, %v2054_v50 }
0x16c1   :  { %v2058_v44 = vsel %vm264_vm6, %v2056_v43, 0.0  ;;  %v2057_v54 = vmul.f32 %v2055_v52, %v2055_v52 }
0x16c2   :  { %2059 = vadd.xlane.f32.xlu0 %v2058_v44 }
0x16c3   :  { %v2061_v55 = vsel %vm264_vm6, %v2057_v54, 0.0 }
0x16c4   :  { %2062 = vadd.xlane.f32.xlu1 %v2061_v55 }
0x174f   :  { %v2060_v15 = vpop.xlane.xlu0 %2059 }
0x1750   :  { %v2064_v59 = vmul.f32 0.03125, %v2060_v15 }
0x1751   :  { %v2063_v34 = vpop.xlane.xlu1 %2062 }
0x1752   :  { %v2066_v35 = vadd.f32 1e-12, %v2064_v59  ;;  %v2065_v60 = vmul.f32 0.03125, %v2063_v34 }
0x1754   :  { %3016 = vrsqrt.f32 %v2066_v35  ;;  %v2067_v61 = vadd.f32 1e-12, %v2065_v60 }
0x1756   :  { %3018 = vrsqrt.f32 %v2067_v61 }
0x175e   :  { %v3017_v63 = vpop.eup %3016 }
0x175f   :  { %v2070_v1 = vmul.f32 %v3017_v63, %v2054_v50 }
0x1760   :  { %v3019_v2 = vpop.eup %3018 }
0x1761   :  { %v2078_v4 = vmul.f32 %v2509_v0, %v2070_v1  ;;  %v2071_v5 = vmul.f32 %v3019_v2, %v2055_v52 }
0x1763   :  { %v2079_v6 = vmul.f32 %v2509_v0, %v2071_v5  ;;  %v2086_v7 = vadd.f32 %v2510_v3, %v2078_v4 }
0x1765   :  { %v2087_v8 = vadd.f32 %v2510_v3, %v2079_v6  ;;  %v2092_v9 = vpack.c.bf16 %v2086_v7, %v2086_v7 }
0x1767   :  { %v2093_v10 = vpack.c.bf16 %v2087_v8, %v2087_v8  ;;  %v2272_v11 = vpack.c.bf16 %v2087_v8, %v2086_v7  ;;  %v2103_v13 = vunpack.c.l.b16 %v2092_v9 }
0x1769   :  { %v2104_v12 = vunpack.c.l.b16 %v2093_v10  ;;  %2834 = vmatmul.mubr.msk.bf16.vlgmr.msra.gmra.mrb[48].mxu0 %vm264_vm6, %v2272_v11 }
0x176b   :  { %v2105_v16 = vrot.slane %v2104_v12, 7 }
0x176d   :  { %v2107_v17 = vsel %vm2106_vm12, %v2105_v16, %v2103_v13 }
0x176e   :  { %v2108_v18 = vpack.c.b16 %v2107_v17, %v2107_v17 }
0x1770   :  { %2818 = vmatmul.mubr.msk.bf16.vlgmr.msra.gmra.mrb[52].mxu1 %vm264_vm6, %v2108_v18 }
0x1771   :  { %2825 = vmatprep.mubr.msk.bf16.mxu1 %vm3128_vm7, %v3127_v62  ;;  %2822 = vmatpush3.bf16.msra.mxu1 %v2958_v19 }
0x1772   :  { %2823 = vmatprep.subr.bf16.mxu1 %v3127_v62 }
0x1775   :  { %2824 = vmatpush3.bf16.msra.mxu1 %v2959_v53 }
0x183c   :  { %v2329_v20 = vpop.f32.mrb[48].mxu0 }
0x183d   :  { %v2330_v24 = vadd.f32 %v2519_v31, %v2329_v20  ;;  %v2835_v25 = vpop.f32.mrb[49].mxu0 }
0x183e   :  { %v2332_v27 = vpop.f32.mrb[50].mxu0 }
0x183f   :  { %2336 = vst [vmem:[#allocation4] sm:$0xff] %v2330_v24  ;;  %v2333_v28 = vadd.f32 %v2519_v31, %v2332_v27  ;;  %v2836_v29 = vpop.f32.mrb[51].mxu0 }
0x1841   :  { %2337 = vst [vmem:[#allocation4 + $0x8] sm:$0xff] %v2333_v28 }
0x1843   :  { %v2158_v33 = vpop.f32.mrb[52].mxu1 }
0x1844   :  { %v2159_v36 = vadd.f32 %v2511_v30, %v2158_v33  ;;  %v2819_v37 = vpop.f32.mrb[53].mxu1 }
0x1845   :  { %v2161_v38 = vpop.f32.mrb[54].mxu1 }
0x1846   :  { %3020 = vtanh.f32 %v2159_v36  ;;  %v2820_v26 = vpop.f32.mrb[55].mxu1 }
0x1850   :  { %v3021_v62 = vpop.eup %3020 }
0x1851   :  { %v2169_v39 = vpack.c.bf16 %v3021_v62, %v3021_v62 }
0x1853   :  { %2826 = vmatmul.mubr.msk.bf16.vlgmr.msra.gmra.mrb[56].mxu1 %vm264_vm6, %v2169_v39 }
0x1926   :  { %v2226_v22 = vpop.f32.mrb[56].mxu1 }
0x1927   :  { %v2227_v41 = vadd.f32 %v2515_v40, %v2226_v22  ;;  %v2827_v42 = vpop.f32.mrb[57].mxu1 }
0x1928   :  { %v2229_v45 = vpop.f32.mrb[58].mxu1 }
0x1929   :  { %2232 = vst [vmem:[#allocation2] sm:$0x3] %v2227_v41  ;;  %v2828_v46 = vpop.f32.mrb[59].mxu1  ;;  %v2235_v47 = vsel %vm2234_vm13, %v2227_v41, -1e+30 }
0x192a   :  { %v2237_v48 = vsel %vm2236_vm14, %v2235_v47, -inf }
0x192b   :  { %2238 = vmax.xlane.f32.xlu1 %v2237_v48 }
0x193c   :  { %2251 = vperm.xlu1 %2913, %v2233_v21  }
0x19b8   :  { %v2239_v49 = vpop.xlane.xlu1 %2238 }
0x19b9   :  { %v2240_v23 = vsub.f32 %v2235_v47, %v2239_v49 }
0x19bb   :  { %v2241_v50 = vmul.f32 1.442695, %v2240_v23 }
0x19bc   :  { %v2252_v55 = vpop.permute.xlu1 %2251 }
0x19bd   :  { %3022 = vpow2.f32 %v2241_v50  ;;  %vm2253_vm15 = vcmp.eq.s32.totalorder %v3315_v32, %v2252_v55 }
0x19c7   :  { %v3023_v51 = vpop.eup %3022 }
0x19c8   :  { %v2243_v52 = vsel %vm2236_vm14, %v3023_v51, 0.0 }
0x19c9   :  { %2244 = vadd.xlane.f32.xlu0 %v2243_v52 }
0x1a56   :  { %v2245_v43 = vpop.xlane.xlu0 %2244 }
0x1a57   :  { %3024 = vlog2.f32 %v2245_v43 }
0x1a61   :  { %v3025_v44 = vpop.eup %3024 }
0x1a62   :  { %v2247_v54 = vmul.f32 0.6931472, %v3025_v44 }
0x1a64   :  { %v2248_v56 = vadd.f32 %v2247_v54, %v2239_v49 }
0x1a66   :  { %v2249_v57 = vsub.f32 %v2227_v41, %v2248_v56 }
0x1a68   :  { %v2254_v14 = vsel %vm2253_vm15, %v2249_v57, 0.0 }
0x1a69   :  { %v2255_v58 = vsel %vm2236_vm14, %v2254_v14, 0.0 }
0x1a6a   :  { %2256 = vadd.xlane.f32.xlu0 %v2255_v58 }
0x1a6b   :  { %3037 = shalt.err (!%p3034_p4)
}
0x1a6c   :  { %s3038_s15 = scalar_lea.hbm %s3287_s27, 256 }
0x1a6d   :  { %p3039_p5 = scmp.ne.s32.totalorder %s3287_s27, %s3038_s15  ;;  %p3042_p6 = scmp.lt.u32.totalorder %s3038_s15, %s3287_s27 }
0x1a6f   :  { %p3044_p7 = pnand %p3042_p6, %p3039_p5 }
0x1a71   :  { %3047 = shalt.err (!%p3044_p7)
}
0x1a72   :  { %s3135_s16 = smov 128   ;;  %s3136_s18 = smov 8  }
0x1a73   :  { %2363 = dma.vmem_to_hbm [thread:$0]  %s2358_s10, 256, %s3287_s27, [#allocation5], %s3135_s16, %s3135_s16, %s3136_s18  }
0x1a74   :  { %s3137_s22 = smov [#allocation2]  }
0x1a75   :  { %s2348_s23 = sshll.u32 %s3137_s22, 4  ;;  %s2349_s23 = int_to_ptr.vmem [resolvable:$true] %s2348_s23 }
0x1a76   :  { %s3048_s26 = scalar_lea.vmem %s2349_s23, 32  ;;  %p3053_p9 = scmp.lt.s32.totalorder %s2349_s23, %s2349_s23 }
0x1a77   :  { %p3049_p8 = scmp.ne.s32.totalorder %s2349_s23, %s3048_s26  ;;  %p3054_p10 = scmp.lt.s32.totalorder %s3048_s26, %s3048_s26 }
0x1a79   :  { %p3055_p11 = por %p3054_p10, %p3053_p9 }
0x1a7b   :  { %p3056_p12 = pnand %p3055_p11, %p3049_p8 }
0x1a7d   :  { %3059 = shalt.err (!%p3056_p12)
}
0x1a7e   :  { %s3060_s28 = scalar_lea.hbm %s3282_s12, 32 }
0x1a7f   :  { %p3061_p13 = scmp.ne.s32.totalorder %s3282_s12, %s3060_s28  ;;  %p3064_p0 = scmp.lt.u32.totalorder %s3060_s28, %s3282_s12 }
0x1a81   :  { %p3066_p1 = pnand %p3064_p0, %p3061_p13 }
0x1a83   :  { %3069 = shalt.err (!%p3066_p1)
}
0x1a84   :  { %2351 = dma.vmem_to_hbm [thread:$0]  %s2349_s23, 32, %s3282_s12, [#allocation3]   ;;  %vm2338_vm0 = vcmp.eq.s32.totalorder %v3315_v32, 0 }
0x1a85   :  { %s3138_s27 = smov [#allocation6]  }
0x1a86   :  { %s2370_s1 = sshll.u32 %s3138_s27, 4  ;;  %s2371_s1 = int_to_ptr.vmem [resolvable:$true] %s2370_s1 }
0x1a87   :  { %s3070_s2 = scalar_lea.vmem %s2371_s1, 16  ;;  %s3074_s12 = scalar_lea.vmem %s2371_s1, 32 }
0x1a88   :  { %p3071_p2 = scmp.ne.s32.totalorder %s2371_s1, %s3070_s2  ;;  %p3075_p3 = scmp.lt.s32.totalorder %s2371_s1, %s2371_s1 }
0x1a89   :  { %p3076_p4 = scmp.lt.s32.totalorder %s3074_s12, %s3070_s2 }
0x1a8b   :  { %p3077_p5 = por %p3076_p4, %p3075_p3 }
0x1a8d   :  { %p3078_p6 = pnand %p3077_p5, %p3071_p2 }
0x1af7   :  { %v2257_v15 = vpop.xlane.xlu0 %2256 }
0x1af8   :  { %v2258_v59 = vsub.f32 0.0, %v2257_v15 }
0x1afa   :  { %v2259_v34 = vsel %vm2236_vm14, %v2258_v59, 0.0 }
0x1afb   :  { %v2260_v35 = vrot.slane %v2259_v34, 4 }
0x1afd   :  { %v2261_v60 = vadd.f32 %v2260_v35, %v2259_v34 }
0x1aff   :  { %v2262_v61 = vrot.slane %v2261_v60, 2 }
0x1b01   :  { %v2263_v63 = vadd.f32 %v2262_v61, %v2261_v60 }
0x1b03   :  { %v2264_v0 = vrot.slane %v2263_v63, 1 }
0x1b05   :  { %v2265_v1 = vadd.f32 %v2264_v0, %v2263_v63 }
0x1b07   :  { %v2267_v2 = vmul.f32 0.5, %v2265_v1 }
0x1b09   :  { %v2339_v3 = vsel %vm2338_vm0, %v2267_v2, 0.0 }
0x1b0a   :  { %2341 = vst [vmem:[#allocation6] sm:$0x1] %v2339_v3 }
0x1b0b   :  { %3081 = shalt.err (!%p3078_p6)
}
0x1b0c   :  { %s3082_s0 = scalar_lea.hbm %s3292_s4, 16 }
0x1b0d   :  { %p3083_p7 = scmp.ne.s32.totalorder %s3292_s4, %s3082_s0  ;;  %p3086_p8 = scmp.lt.u32.totalorder %s3082_s0, %s3292_s4 }
0x1b0f   :  { %p3088_p9 = pnand %p3086_p8, %p3083_p7 }
0x1b11   :  { %3091 = shalt.err (!%p3088_p9)
}
0x1b12   :  { %2373 = dma.vmem_to_hbm [thread:$0]  %s2371_s1, 16, %s3292_s4, [#allocation5]  }
0x1b13   :  { %3092 = dma.done.wait [#allocation3], 32  }
0x1b14   :  { %3093 = vsyncadd [#allocation3], 4294967264 }
0x1b15   :  { %3094 = dma.done.wait [#allocation5], 272  }
0x1b16   :  { %3095 = vsyncadd [#allocation5], 4294967024 }
0x1b17   :  { %2383 = vsyncpa [#allocation3], 1 }
0x1b18   :  { %2384 = vsyncpa [#allocation5], 1 }

</bundles_post_ra>
